<compile_context>
chip_gen: v6e
topology: v6e:2x2x1
jax: 0.10.0
libtpu: 0.0.40
codegen_flags: <defaults>
</compile_context>

<pallas_src>
import functools
import numpy as np
import jax
import jax.numpy as jnp
from jax.experimental import pallas as pl
from jax.experimental.pallas import tpu as pltpu

_BN_EPS = 1e-5
_VMEM = pltpu.MemorySpace.VMEM
_VMEM_LIMIT = 48 * 1024 * 1024          # stays inside v7x's 64 MiB physical VMEM


def _row_tile(m, target=512):
    """Largest row tile <= target that evenly divides m (multiple of 8)."""
    if m <= target:
        return m
    for tm in range(target, 7, -8):
        if m % tm == 0:
            return tm
    return m


# ---------------------------------------------------------------------------
# Pallas kernels
# ---------------------------------------------------------------------------
def _gemm_stats_kernel(a_ref, w_ref, y_ref, sum_ref, ssq_ref):
    """bf16 GEMM tile -> f32 y tile, plus per-column sum / sum-of-squares
    accumulated across the (arbitrary) M grid axis for BatchNorm."""
    @pl.when(pl.program_id(0) == 0)
    def _():
        sum_ref[...] = jnp.zeros_like(sum_ref)
        ssq_ref[...] = jnp.zeros_like(ssq_ref)

    y = jnp.dot(a_ref[...], w_ref[...], preferred_element_type=jnp.float32)
    y_ref[...] = y
    sum_ref[...] += jnp.sum(y, axis=0, keepdims=True)
    ssq_ref[...] += jnp.sum(y * y, axis=0, keepdims=True)


def conv_gemm_stats(a, w):
    """a: (M, K) bf16, w: (K, N) bf16 -> (y f32, colsum (1,N), colsumsq (1,N))."""
    m, k = a.shape
    n = w.shape[1]
    tm = _row_tile(m)
    return pl.pallas_call(
        _gemm_stats_kernel,
        grid=(m // tm,),
        out_shape=(jax.ShapeDtypeStruct((m, n), jnp.float32),
                   jax.ShapeDtypeStruct((1, n), jnp.float32),
                   jax.ShapeDtypeStruct((1, n), jnp.float32)),
        in_specs=[pl.BlockSpec((tm, k), lambda i: (i, 0)),
                  pl.BlockSpec((k, n), lambda i: (0, 0))],
        out_specs=(pl.BlockSpec((tm, n), lambda i: (i, 0)),
                   pl.BlockSpec((1, n), lambda i: (0, 0)),
                   pl.BlockSpec((1, n), lambda i: (0, 0))),
        compiler_params=pltpu.CompilerParams(
            dimension_semantics=("arbitrary",),
            vmem_limit_bytes=_VMEM_LIMIT),
    )(a, w)


def _conv_tap_stats_kernel(x_ref, w_ref, y_ref, sum_ref, ssq_ref, *, k, ho, wo):
    """Stride-1 kxk conv for one batch image by accumulating k*k shifted taps.
    The padded image is read from HBM once (no 9x im2col duplication)."""
    @pl.when(pl.program_id(0) == 0)
    def _():
        sum_ref[...] = jnp.zeros_like(sum_ref)
        ssq_ref[...] = jnp.zeros_like(ssq_ref)

    cin = x_ref.shape[3]
    cout = w_ref.shape[2]
    acc = jnp.zeros((ho * wo, cout), jnp.float32)
    for i in range(k):
        for j in range(k):
            patch = x_ref[0, i:i + ho, j:j + wo, :]            # (ho, wo, cin)
            acc = acc + jnp.dot(patch.reshape(ho * wo, cin), w_ref[i * k + j],
                                preferred_element_type=jnp.float32)
    y_ref[0] = acc.reshape(ho, wo, cout)
    sum_ref[...] += jnp.sum(acc, axis=0, keepdims=True)
    ssq_ref[...] += jnp.sum(acc * acc, axis=0, keepdims=True)


def conv_tap_stats(x_pad, w_taps, ho, wo):
    """x_pad: (B, Hp, Wp, Cin) bf16, w_taps: (k*k, Cin, Cout) bf16."""
    b, hp, wp, cin = x_pad.shape
    kk, _, cout = w_taps.shape
    k = int(round(kk ** 0.5))
    y, s, ss = pl.pallas_call(
        functools.partial(_conv_tap_stats_kernel, k=k, ho=ho, wo=wo),
        grid=(b,),
        out_shape=(jax.ShapeDtypeStruct((b, ho, wo, cout), jnp.float32),
                   jax.ShapeDtypeStruct((1, cout), jnp.float32),
                   jax.ShapeDtypeStruct((1, cout), jnp.float32)),
        in_specs=[pl.BlockSpec((1, hp, wp, cin), lambda i: (i, 0, 0, 0)),
                  pl.BlockSpec((kk, cin, cout), lambda i: (0, 0, 0))],
        out_specs=(pl.BlockSpec((1, ho, wo, cout), lambda i: (i, 0, 0, 0)),
                   pl.BlockSpec((1, cout), lambda i: (0, 0)),
                   pl.BlockSpec((1, cout), lambda i: (0, 0))),
        compiler_params=pltpu.CompilerParams(
            dimension_semantics=("arbitrary",),
            vmem_limit_bytes=_VMEM_LIMIT),
    )(x_pad, w_taps)
    return y.reshape(b * ho * wo, cout), s, ss


def _bn_act_kernel(y_ref, sum_ref, ssq_ref, g_ref, b_ref, o_ref, *, m, relu):
    inv_m = 1.0 / m
    mean = sum_ref[...] * inv_m
    var = jnp.maximum(ssq_ref[...] * inv_m - mean * mean, 0.0)
    scale = g_ref[...] * jax.lax.rsqrt(var + _BN_EPS)
    shift = b_ref[...] - mean * scale
    out = y_ref[...] * scale + shift
    if relu:
        out = jnp.maximum(out, 0.0)
    o_ref[...] = out.astype(o_ref.dtype)


def _bn_add_relu_kernel(y_ref, sum_ref, ssq_ref, g_ref, b_ref, res_ref, o_ref, *, m):
    inv_m = 1.0 / m
    mean = sum_ref[...] * inv_m
    var = jnp.maximum(ssq_ref[...] * inv_m - mean * mean, 0.0)
    scale = g_ref[...] * jax.lax.rsqrt(var + _BN_EPS)
    shift = b_ref[...] - mean * scale
    out = y_ref[...] * scale + shift + res_ref[...].astype(jnp.float32)
    o_ref[...] = jnp.maximum(out, 0.0).astype(o_ref.dtype)


def bn_apply(y, colsum, colsumsq, gamma, beta, relu, residual=None):
    m, n = y.shape
    tm = _row_tile(m)
    row = pl.BlockSpec((tm, n), lambda i: (i, 0))
    vec = pl.BlockSpec((1, n), lambda i: (0, 0))
    g = gamma.reshape(1, n).astype(jnp.float32)
    b = beta.reshape(1, n).astype(jnp.float32)
    if residual is None:
        kernel = functools.partial(_bn_act_kernel, m=float(m), relu=relu)
        args = (y, colsum, colsumsq, g, b)
        in_specs = [row, vec, vec, vec, vec]
    else:
        kernel = functools.partial(_bn_add_relu_kernel, m=float(m))
        args = (y, colsum, colsumsq, g, b, residual.reshape(m, n))
        in_specs = [row, vec, vec, vec, vec, row]
    return pl.pallas_call(
        kernel,
        grid=(m // tm,),
        out_shape=jax.ShapeDtypeStruct((m, n), jnp.bfloat16),
        in_specs=in_specs,
        out_specs=row,
        compiler_params=pltpu.CompilerParams(
            dimension_semantics=("parallel",),
            vmem_limit_bytes=_VMEM_LIMIT),
    )(*args)


def _matmul_kernel(a_ref, w_ref, o_ref):
    o_ref[...] = jnp.dot(a_ref[...], w_ref[...],
                         preferred_element_type=jnp.float32).astype(o_ref.dtype)


def matmul(a, w, out_dtype=jnp.bfloat16):
    m, k = a.shape
    n = w.shape[1]
    tm = _row_tile(m)
    return pl.pallas_call(
        _matmul_kernel,
        grid=(m // tm,),
        out_shape=jax.ShapeDtypeStruct((m, n), out_dtype),
        in_specs=[pl.BlockSpec((tm, k), lambda i: (i, 0)),
                  pl.BlockSpec((k, n), lambda i: (0, 0))],
        out_specs=pl.BlockSpec((tm, n), lambda i: (i, 0)),
        compiler_params=pltpu.CompilerParams(
            dimension_semantics=("parallel",),
            vmem_limit_bytes=_VMEM_LIMIT),
    )(a, w)


def _matmul_bias_kernel(a_ref, w_ref, b_ref, o_ref):
    o_ref[...] = (jnp.dot(a_ref[...], w_ref[...],
                          preferred_element_type=jnp.float32) + b_ref[...])


def matmul_bias(a, w, bias):
    m, k = a.shape
    n = w.shape[1]
    tm = _row_tile(m)
    return pl.pallas_call(
        _matmul_bias_kernel,
        grid=(m // tm,),
        out_shape=jax.ShapeDtypeStruct((m, n), jnp.float32),
        in_specs=[pl.BlockSpec((tm, k), lambda i: (i, 0)),
                  pl.BlockSpec((k, n), lambda i: (0, 0)),
                  pl.BlockSpec((1, n), lambda i: (0, 0))],
        out_specs=pl.BlockSpec((tm, n), lambda i: (i, 0)),
        compiler_params=pltpu.CompilerParams(
            dimension_semantics=("parallel",),
            vmem_limit_bytes=_VMEM_LIMIT),
    )(a, w, bias.reshape(1, n).astype(jnp.float32))


def _attn_kernel(q_ref, k_ref, v_ref, r_ref, o_ref, *, scale, batch):
    q = q_ref[...]                                   # (B*nh, S, d) bf16
    k = k_ref[...]
    v = v_ref[...]
    r = r_ref[...]                                   # (nh, S, d) shared over batch
    nh, s, d = r.shape
    # q@k^T + q@r^T == q@(k+r)^T  ->  a single batched matmul over all B*heads.
    kr = (k.reshape(batch, nh, s, d) + r[None]).reshape(batch * nh, s, d)
    logits = jnp.einsum('bqd,bkd->bqk', q, kr,
                        preferred_element_type=jnp.float32) * scale
    mx = jnp.max(logits, axis=-1, keepdims=True)
    p = jnp.exp(logits - mx)
    p = p * pl.reciprocal(jnp.sum(p, axis=-1, keepdims=True), approx=True)
    out = jnp.einsum('bqk,bkd->bqd', p.astype(v.dtype), v,
                     preferred_element_type=jnp.float32)
    o_ref[...] = out.astype(o_ref.dtype)


def attention(q, k, v, r, batch, scale):
    bh, s, d = q.shape
    vm = pl.BlockSpec(memory_space=_VMEM)
    return pl.pallas_call(
        functools.partial(_attn_kernel, scale=scale, batch=batch),
        out_shape=jax.ShapeDtypeStruct((bh, s, d), jnp.bfloat16),
        in_specs=[vm, vm, vm, vm],
        out_specs=vm,
        compiler_params=pltpu.CompilerParams(vmem_limit_bytes=_VMEM_LIMIT),
    )(q, k, v, r)


# ---------------------------------------------------------------------------
# JAX glue: im2col (stride-2 convs only), conv block, MHSA, pooling
# ---------------------------------------------------------------------------
def im2col(x, k, stride, pad):
    # x: NHWC bf16.  Only used for the three stride-2 spatial convs.
    if pad:
        x = jnp.pad(x, ((0, 0), (pad, pad), (pad, pad), (0, 0)))
    b, hp, wp, c = x.shape
    ho = (hp - k) // stride + 1
    wo = (wp - k) // stride + 1
    cols = []
    for i in range(k):
        for j in range(k):
            cols.append(x[:, i:i + stride * ho:stride, j:j + stride * wo:stride, :])
    p = jnp.stack(cols, axis=3)                       # (B, Ho, Wo, k*k, C)
    return p.reshape(b * ho * wo, k * k * c), ho, wo


def conv_bn(x, p, residual=None):
    """Conv (Pallas GEMM) + train-mode BatchNorm (+ReLU / fused residual+ReLU)."""
    b = x.shape[0]
    k, stride, pad = p['k'], p['stride'], p['pad']
    cout = p['gamma'].shape[0]
    if k == 1:
        if stride > 1:
            # TODO(synk): stride-2 1x1 conv still uses an XLA strided slice
            # instead of expressing the stride in the GEMM input index_map.
            x = x[:, ::stride, ::stride, :]
        _, ho, wo, cin = x.shape
        y, s, ss = conv_gemm_stats(x.reshape(b * ho * wo, cin),
                                   p['w'].reshape(cin, cout))
    elif stride == 1:
        cin = x.shape[-1]
        ho = x.shape[1] + 2 * pad - k + 1
        wo = x.shape[2] + 2 * pad - k + 1
        x_pad = jnp.pad(x, ((0, 0), (pad, pad), (pad, pad), (0, 0)))
        y, s, ss = conv_tap_stats(x_pad, p['w'].reshape(k * k, cin, cout), ho, wo)
    else:
        # TODO(synk): the stride-2 spatial convs (7x7 stem + two 3x3) still
        # materialize an im2col patch tensor before the tiled GEMM.
        cin = x.shape[-1]
        a, ho, wo = im2col(x, k, stride, pad)
        y, s, ss = conv_gemm_stats(a, p['w'].reshape(k * k * cin, cout))
    out = bn_apply(y, s, ss, p['gamma'], p['beta'], relu=p['act'],
                   residual=residual)
    return out.reshape(b, ho, wo, cout)


def mhsa_forward(x, p, num_heads):
    # TODO(synk): BottleNeck_MHSA source is not provided; this implements the
    # standard BoTNet MHSA (1x1 qkv projections w/o bias, relative H/W
    # content-position logits, softmax), dropout=0.0, at the actual feature size.
    b, h, w, c = x.shape
    hd = c // num_heads
    s = h * w
    qkv = matmul(x.reshape(b * s, c), p['wqkv'])               # fused (C, 3C) GEMM
    qkv = qkv.reshape(b, s, 3, num_heads, hd)

    def heads(t):
        return t.transpose(0, 2, 1, 3).reshape(b * num_heads, s, hd)

    q, k, v = heads(qkv[:, :, 0]), heads(qkv[:, :, 1]), heads(qkv[:, :, 2])
    r = p['rel_h'][:, :, :, None] + p['rel_w'][:, :, None, :]   # (nh, hd, H, W)
    r = r.reshape(num_heads, hd, s).transpose(0, 2, 1).astype(jnp.bfloat16)
    out = attention(q, k, v, r, batch=b, scale=1.0 / float(np.sqrt(hd)))
    return (out.reshape(b, num_heads, s, hd)
               .transpose(0, 2, 1, 3)
               .reshape(b, h, w, c))


def max_pool_3x3_s2(x):
    return jax.lax.reduce_window(
        x, jnp.array(-jnp.inf, x.dtype), jax.lax.max,
        (1, 3, 3, 1), (1, 2, 2, 1),
        [(0, 0), (1, 1), (1, 1), (0, 0)])


def avg_pool_2x2(x):
    b, h, w, c = x.shape
    return (x.reshape(b, h // 2, 2, w // 2, 2, c)
             .astype(jnp.float32).mean(axis=(2, 4)).astype(x.dtype))


# ---------------------------------------------------------------------------
# Parameter construction (deterministic)
# ---------------------------------------------------------------------------
class _KeyGen:
    def __init__(self, seed):
        self._key = jax.random.PRNGKey(seed)
        self._i = 0

    def next(self):
        self._i += 1
        return jax.random.fold_in(self._key, self._i)


def mk_convblock(kg, cin, cout, k, stride, pad, act):
    # Conv bias omitted: zero-initialized in the reference and cancelled
    # exactly by the BatchNorm mean subtraction.
    std = float(np.sqrt(2.0 / (k * k * cout)))
    w = jax.random.normal(kg.next(), (k, k, cin, cout), jnp.float32) * std
    return dict(w=w.astype(jnp.bfloat16),
                gamma=jnp.ones((cout,), jnp.float32),
                beta=jnp.zeros((cout,), jnp.float32),
                k=k, stride=stride, pad=pad, act=act)


def mk_mhsa(kg, c, num_heads, h, w):
    hd = c // num_heads
    std = float(1.0 / np.sqrt(c))
    wq = jax.random.normal(kg.next(), (c, c), jnp.float32) * std
    wk = jax.random.normal(kg.next(), (c, c), jnp.float32) * std
    wv = jax.random.normal(kg.next(), (c, c), jnp.float32) * std
    return dict(
        wqkv=jnp.concatenate([wq, wk, wv], axis=1).astype(jnp.bfloat16),
        rel_h=jax.random.normal(kg.next(), (num_heads, hd, h), jnp.float32) * 0.02,
        rel_w=jax.random.normal(kg.next(), (num_heads, hd, w), jnp.float32) * 0.02)


def build_bot_vit(seed, mhsa_num_heads, num_classes, in_channels, input_hw):
    kg = _KeyGen(seed)
    params = {'num_heads': mhsa_num_heads}
    params['stem'] = mk_convblock(kg, in_channels, 64, 7, 2, 3, True)
    h = (input_hw + 2 * 3 - 7) // 2 + 1        # stem conv
    h = (h + 2 * 1 - 3) // 2 + 1               # max pool

    cfgs = [
        (3, 64, 64, 64, 256, True, False),
        (4, 256, 128, 128, 512, False, False),
        (6, 512, 256, 256, 1024, False, False),
        (3, 1024, 512, 512, 2048, False, True),
    ]
    groups = []
    for (nb, cin, c1, c3, c4, bold, last) in cfgs:
        blocks = []
        downsample = True
        for _ in range(nb):
            blk = {'last': last}
            stride = 1 if bold else 2
            blk['conv1'] = mk_convblock(kg, cin, c1, 1, 1, 0, True)
            if not last:
                blk['conv2'] = mk_convblock(kg, c1, c3, 3, stride, 1, True)
            else:
                blk['mhsa'] = mk_mhsa(kg, c1, mhsa_num_heads, h, h)
                blk['avgpool'] = (not bold)
            blk['conv3'] = mk_convblock(kg, c3, c4, 1, 1, 0, False)
            blk['identity'] = (mk_convblock(kg, cin, c4, 1, stride, 0, False)
                               if downsample else None)
            blocks.append(blk)
            cin = c4
            if not bold:
                bold = True
                h = h // 2
            downsample = False
        groups.append(blocks)
    params['groups'] = groups
    params['fc_w'] = (jax.random.normal(kg.next(), (2048, num_classes),
                                        jnp.float32) * 0.02).astype(jnp.bfloat16)
    params['fc_b'] = jnp.zeros((num_classes,), jnp.float32)
    return params


# ---------------------------------------------------------------------------
# Forward pass
# ---------------------------------------------------------------------------
def bot_vit_forward(params, x_nchw):
    # PyTorch NCHW input -> NHWC, bf16 activations for the MXU.
    x = jnp.transpose(x_nchw, (0, 2, 3, 1)).astype(jnp.bfloat16)
    x = conv_bn(x, params['stem'])
    x = max_pool_3x3_s2(x)

    nh = params['num_heads']
    for blocks in params['groups']:
        for blk in blocks:
            res = x
            y = conv_bn(x, blk['conv1'])
            if not blk['last']:
                y = conv_bn(y, blk['conv2'])
            else:
                y = mhsa_forward(y, blk['mhsa'], nh)
                if blk['avgpool']:
                    y = avg_pool_2x2(y)
            if blk['identity'] is not None:
                res = conv_bn(res, blk['identity'])
            # residual add + ReLU fused into conv3's BN epilogue.
            x = conv_bn(y, blk['conv3'], residual=res)

    feat = jnp.mean(x.astype(jnp.float32), axis=(1, 2))        # adaptive avg pool (1,1)
    logits = matmul_bias(feat.astype(jnp.bfloat16), params['fc_w'], params['fc_b'])
    return logits


if __name__ == "__main__":
    key = jax.random.PRNGKey(0)
    B, C, HW = 2, 3, 64
    x = jax.random.normal(key, (B, C, HW, HW), jnp.float32)

    params = build_bot_vit(seed=0, mhsa_num_heads=4, num_classes=10,
                           in_channels=C, input_hw=HW)
    out = bot_vit_forward(params, x)
    out = jax.block_until_ready(out)
    assert out.shape == (B, 10)
    assert bool(jnp.all(jnp.isfinite(out)))
    print("KERNEL_OK")
</pallas_src>

<mosaic_0001>
module attributes {stable_mosaic.version = 11 : i64} {
  func.func @_gemm_stats_kernel(%arg0: i32, %arg1: memref<512x147xbf16, #tpu.memory_space<vmem>>, %arg2: memref<147x64xbf16, #tpu.memory_space<vmem>>, %arg3: memref<512x64xf32, #tpu.memory_space<vmem>>, %arg4: memref<1x64xf32, #tpu.memory_space<vmem>>, %arg5: memref<1x64xf32, #tpu.memory_space<vmem>>) attributes {dimension_semantics = [#tpu.dimension_semantics<arbitrary>], iteration_bounds = array<i64: 4>, scalar_prefetch = 0 : i64, scratch_operands = 0 : i64, tpu.core_type = #tpu.core_type<tc>, window_params = [{transform_indices = @transform_0, window_bounds = array<i64: 512, 147>}, {pipeline_mode = #tpu.pipeline_mode<synchronous>, transform_indices = @transform_1, window_bounds = array<i64: 147, 64>}, {transform_indices = @transform_2, window_bounds = array<i64: 512, 64>}, {pipeline_mode = #tpu.pipeline_mode<synchronous>, transform_indices = @transform_3, window_bounds = array<i64: 1, 64>}, {pipeline_mode = #tpu.pipeline_mode<synchronous>, transform_indices = @transform_4, window_bounds = array<i64: 1, 64>}]} {
    %c0_i32 = arith.constant 0 : i32
    %0 = arith.cmpi eq, %arg0, %c0_i32 : i32
    %1 = arith.extui %0 : i1 to i32
    %c0_i32_0 = arith.constant 0 : i32
    %2 = arith.cmpi ne, %1, %c0_i32_0 : i32
    scf.if %2 {
      %cst_16 = arith.constant 0.000000e+00 : f32
      %18 = vector.broadcast %cst_16 : f32 to vector<1x64xf32>
      %c0_17 = arith.constant 0 : index
      %c0_18 = arith.constant 0 : index
      %19 = vector.load %arg4[%c0_17, %c0_18] : memref<1x64xf32, #tpu.memory_space<vmem>>, vector<1x64xf32>
      tpu.vector_store %arg4[%c0_17, %c0_18], %18 {strides = array<i32>} : memref<1x64xf32, #tpu.memory_space<vmem>>, vector<1x64xf32>,
      %cst_19 = arith.constant 0.000000e+00 : f32
      %20 = vector.broadcast %cst_19 : f32 to vector<1x64xf32>
      %c0_20 = arith.constant 0 : index
      %c0_21 = arith.constant 0 : index
      %21 = vector.load %arg5[%c0_20, %c0_21] : memref<1x64xf32, #tpu.memory_space<vmem>>, vector<1x64xf32>
      tpu.vector_store %arg5[%c0_20, %c0_21], %20 {strides = array<i32>} : memref<1x64xf32, #tpu.memory_space<vmem>>, vector<1x64xf32>,
    } else {
    }
    %c0 = arith.constant 0 : index
    %c0_1 = arith.constant 0 : index
    %3 = vector.load %arg1[%c0, %c0_1] : memref<512x147xbf16, #tpu.memory_space<vmem>>, vector<512x147xbf16>
    %c0_2 = arith.constant 0 : index
    %c0_3 = arith.constant 0 : index
    %4 = vector.load %arg2[%c0_2, %c0_3] : memref<147x64xbf16, #tpu.memory_space<vmem>>, vector<147x64xbf16>
    %cst = arith.constant dense<0.000000e+00> : vector<512x64xf32>
    %5 = tpu.matmul %3, %4, %cst {dimension_numbers = #tpu.dot_dimension_numbers<[1], [0], [0], [1], [0, 0, 1, 1], [], []>} : vector<512x147xbf16>, vector<147x64xbf16>, vector<512x64xf32> -> vector<512x64xf32>
    %c0_4 = arith.constant 0 : index
    %c0_5 = arith.constant 0 : index
    %6 = vector.load %arg3[%c0_4, %c0_5] : memref<512x64xf32, #tpu.memory_space<vmem>>, vector<512x64xf32>
    tpu.vector_store %arg3[%c0_4, %c0_5], %5 {strides = array<i32>} : memref<512x64xf32, #tpu.memory_space<vmem>>, vector<512x64xf32>,
    %c0_6 = arith.constant 0 : index
    %c0_7 = arith.constant 0 : index
    %7 = vector.load %arg4[%c0_6, %c0_7] : memref<1x64xf32, #tpu.memory_space<vmem>>, vector<1x64xf32>
    %cst_8 = arith.constant dense<0.000000e+00> : vector<64xf32>
    %8 = vector.multi_reduction <add>, %5, %cst_8 [0] : vector<512x64xf32> to vector<64xf32>
    %9 = vector.shape_cast %8 : vector<64xf32> to vector<1x64xf32>
    %10 = arith.addf %7, %9 : vector<1x64xf32>
    %c0_9 = arith.constant 0 : index
    %c0_10 = arith.constant 0 : index
    %11 = vector.load %arg4[%c0_9, %c0_10] : memref<1x64xf32, #tpu.memory_space<vmem>>, vector<1x64xf32>
    tpu.vector_store %arg4[%c0_9, %c0_10], %10 {strides = array<i32>} : memref<1x64xf32, #tpu.memory_space<vmem>>, vector<1x64xf32>,
    %c0_11 = arith.constant 0 : index
    %c0_12 = arith.constant 0 : index
    %12 = vector.load %arg5[%c0_11, %c0_12] : memref<1x64xf32, #tpu.memory_space<vmem>>, vector<1x64xf32>
    %13 = arith.mulf %5, %5 : vector<512x64xf32>
    %cst_13 = arith.constant dense<0.000000e+00> : vector<64xf32>
    %14 = vector.multi_reduction <add>, %13, %cst_13 [0] : vector<512x64xf32> to vector<64xf32>
    %15 = vector.shape_cast %14 : vector<64xf32> to vector<1x64xf32>
    %16 = arith.addf %12, %15 : vector<1x64xf32>
    %c0_14 = arith.constant 0 : index
    %c0_15 = arith.constant 0 : index
    %17 = vector.load %arg5[%c0_14, %c0_15] : memref<1x64xf32, #tpu.memory_space<vmem>>, vector<1x64xf32>
    tpu.vector_store %arg5[%c0_14, %c0_15], %16 {strides = array<i32>} : memref<1x64xf32, #tpu.memory_space<vmem>>, vector<1x64xf32>,
    return
  }
  func.func @transform_0(%arg0: i32) -> (i32, i32) {
    %c0_i32 = arith.constant 0 : i32
    %c0_i32_0 = arith.constant 0 : i32
    return %arg0, %c0_i32 : i32, i32
  }
  func.func @transform_1(%arg0: i32) -> (i32, i32) {
    %c0_i32 = arith.constant 0 : i32
    %c0_i32_0 = arith.constant 0 : i32
    %c0_i32_1 = arith.constant 0 : i32
    return %c0_i32, %c0_i32_0 : i32, i32
  }
  func.func @transform_2(%arg0: i32) -> (i32, i32) {
    %c0_i32 = arith.constant 0 : i32
    %c0_i32_0 = arith.constant 0 : i32
    return %arg0, %c0_i32 : i32, i32
  }
  func.func @transform_3(%arg0: i32) -> (i32, i32) {
    %c0_i32 = arith.constant 0 : i32
    %c0_i32_0 = arith.constant 0 : i32
    %c0_i32_1 = arith.constant 0 : i32
    return %c0_i32, %c0_i32_0 : i32, i32
  }
  func.func @transform_4(%arg0: i32) -> (i32, i32) {
    %c0_i32 = arith.constant 0 : i32
    %c0_i32_0 = arith.constant 0 : i32
    %c0_i32_1 = arith.constant 0 : i32
    return %c0_i32, %c0_i32_0 : i32, i32
  }
}

</mosaic_0001>

<bundles_post_ra>
// kernel: tpu_custom_call.1
= control target key start
LH: loop header
LB: loop body
LE: loop exit
PB: predicated region body
PF: predicated region fallthrough
CT: control target
= control target key end

     0   :  { %10 = vsyncpa [#allocation3], 0  ;;  %s2665_s0 = inlined_call_operand.vmem [shape: bf16[2048,147], index: 0, kind: input, shape index: {}]   ;;  %s2666_s1 = inlined_call_operand.vmem [shape: bf16[147,64], index: 1, kind: input, shape index: {}]   ;;  %s2667_s2 = inlined_call_operand.vmem [shape: f32[2048,64], index: 2, kind: output, shape index: {0}]   ;;  %s2668_s3 = inlined_call_operand.hbm [shape: f32[1,64], index: 3, kind: output, shape index: {1}]   ;;  %s2669_s4 = inlined_call_operand.hbm [shape: f32[1,64], index: 4, kind: output, shape index: {2}]  }
   0x1   :  { %11 = vsyncpa [#allocation5], 0  ;;  %s1903_s15 = smov 0  }
   0x2 LB: > { %s1909_s16 = sadd.s32 4294967295, %s1871_s15   ;;  %p1538_p0 = scmp.ge.s32.totalorder %s1871_s15, 1  ;;  %s1871_s15 = sphi %s1903_s15, %s17_s15  }
   0x3   : > { %p161_p1 = scmp.lt.s32.totalorder %s1871_s15, 5 }
   0x5   : > { %p162_p2 = pnand %p1538_p0, %p161_p1 }
   0x6   : > { %s1539_s17 = sshll.u32 (!%p162_p2), %s1909_s16, 6  ;;  %p1544_p4 = scmp.ne.s32.totalorder (!%p162_p2), %s1909_s16, 0 }
   0x7   : > { %165 = sbr.rel (%p162_p2) target bundleno = 476 (0x1dc), region = 28  ;;  %p189_p3 = scmp.lt.s32.totalorder (!%p162_p2), %s1539_s17, 255 }
   0xc   : > { %s2671_s17 = smov (!%p189_p3, %s1539_s17), 255  ;;  %205 = sbr.rel (%p1544_p4) target bundleno = 19 (0x13), region = 32 }
   0xd   : > { %s1657_s18 = sshll.u32 %s2671_s17, 3 }
   0xe   : > { %s1917_s21 = scalar_lea.vmem %s2665_s0, %s1657_s18  ;;  %s1922_s24 = scalar_lea.vmem %s2667_s2, %s1657_s18 }
  0x11   : > { %vm206_vm0 = vcmask 516096   ;;  %v1873_v0 = vmov 0.0  }
  0x12   : > { %207 = vst.msk [vmem:[#allocation2] sm:$0x1] %vm206_vm0, %v1873_v0  ;;  %208 = vst.msk [vmem:[#allocation4] sm:$0x1] %vm206_vm0, %v1873_v0 }
  0x13 PF: > { %v1703_v1 = vld [vmem:[%s2666_s1 + $0x38] sm:$0xff]   ;;  %v1874_v2 = vmov 0   ;;  %v1704_v3 = vld [vmem:[%s2666_s1 + $0x30] sm:$0xff]   ;;  %v1705_v4 = vld [vmem:[%s2666_s1 + $0x28] sm:$0xff]   ;;  %vm637_vm1 = vcmask 154624   ;;  %vm734_vm2 = vcmask 1040384  }
  0x14   : > { %741 = vmatprep.subr.bf16.mxu0 %v1874_v2  ;;  %1658 = vmatprep.subr.bf16.mxu1 %v1874_v2  ;;  %v1706_v5 = vld [vmem:[%s2666_s1 + $0x20] sm:$0xff]   ;;  %v1707_v7 = vld [vmem:[%s2666_s1 + $0x18] sm:$0xff]   ;;  %v1708_v8 = vld [vmem:[%s2666_s1 + $0x10] sm:$0xff]   ;;  %vm735_vm3 = vcmask 1041408   ;;  %v1875_v11 = vmov 65535   ;;  %vm1030_vm4 = vcmask 523264  }
  0x15   : > { %742 = vmatpush1.bf16.msra.mxu0 %v1703_v1  ;;  %1668 = vmatpush1.bf16.msra.mxu1 %v1703_v1  ;;  %v1715_v6 = vld [vmem:[%s1917_s21 + $0x4] ss:$8 sps:$4 sm:$0xff]   ;;  %v736_v12 = vsel %vm734_vm2, 4294967295, %v1875_v11  ;;  %v1711_v14 = vld [vmem:[%s2666_s1 + $0x48] ss:$0 sps:$4 sm:$0x33]  }
  0x16   : > { %743 = vmatprep.subr.bf16.mxu0 %v1874_v2  ;;  %1659 = vmatprep.subr.bf16.mxu1 %v1874_v2  ;;  %v1739_v9 = vld [vmem:[%s1917_s21 + $0x104] ss:$8 sps:$4 sm:$0xff]   ;;  %v737_v15 = vsel %vm735_vm3, %v736_v12, 0  ;;  %v1713_v18 = vld [vmem:[%s1917_s21] ss:$8 sps:$4 sm:$0xff]   ;;  %vm1230_vm5 = vcmask 516096  }
  0x17   : > { %1619 = vmatprep.mubr.msk.bf16.mxu0 %vm637_vm1, %v1715_v6  ;;  %v1709_v10 = vld [vmem:[%s2666_s1 + $0x8] sm:$0xff]   ;;  %1635 = vmatprep.mubr.msk.bf16.mxu1 %vm637_vm1, %v1739_v9  ;;  %v1710_v13 = vld [vmem:[%s2666_s1] sm:$0xff]   ;;  %v739_v16 = vand.u32 %v1711_v14, %v737_v15  ;;  %v1716_v20 = vld [vmem:[%s1917_s21 + $0x14] ss:$8 sps:$4 sm:$0xff]   ;;  %p1686_p5 = scmp.eq.s32.totalorder %s1909_s16, 3  ;;  %s1877_s23 = smov [#allocation4]  }
  0x18   : > { %v1712_v17 = vld [vmem:[%s2666_s1 + $0x40] sm:$0xff]   ;;  %v1743_v21 = vld [vmem:[%s1917_s21 + $0x114] ss:$8 sps:$4 sm:$0xff]   ;;  %v1718_v22 = vld [vmem:[%s1917_s21 + $0x10] ss:$8 sps:$4 sm:$0xff]  }
  0x19   : > { %744 = vmatpush1.bf16.msra.mxu0 %v1704_v3  ;;  %1669 = vmatpush1.bf16.msra.mxu1 %v1704_v3  ;;  %v1737_v19 = vld [vmem:[%s1917_s21 + $0x100] ss:$8 sps:$4 sm:$0xff]   ;;  %v1745_v23 = vld [vmem:[%s1917_s21 + $0x110] ss:$8 sps:$4 sm:$0xff]   ;;  %v1719_v24 = vld [vmem:[%s1917_s21 + $0x24] ss:$8 sps:$4 sm:$0xff]  }
  0x1a   : > { %745 = vmatprep.subr.bf16.mxu0 %v1874_v2  ;;  %1660 = vmatprep.subr.bf16.mxu1 %v1874_v2  ;;  %v1749_v25 = vld [vmem:[%s1917_s21 + $0x124] ss:$8 sps:$4 sm:$0xff]   ;;  %v1721_v26 = vld [vmem:[%s1917_s21 + $0x20] ss:$8 sps:$4 sm:$0xff]   ;;  %v1722_v28 = vld [vmem:[%s1917_s21 + $0x34] ss:$8 sps:$4 sm:$0xff]  }
  0x1b   : > { %v1751_v27 = vld [vmem:[%s1917_s21 + $0x120] ss:$8 sps:$4 sm:$0xff]   ;;  %v1755_v29 = vld [vmem:[%s1917_s21 + $0x134] ss:$8 sps:$4 sm:$0xff]   ;;  %v1724_v30 = vld [vmem:[%s1917_s21 + $0x30] ss:$8 sps:$4 sm:$0xff]  }
  0x1c   : > { %v1757_v31 = vld [vmem:[%s1917_s21 + $0x130] ss:$8 sps:$4 sm:$0xff]   ;;  %v1725_v32 = vld [vmem:[%s1917_s21 + $0x44] ss:$8 sps:$4 sm:$0xff]   ;;  %v1727_v34 = vld [vmem:[%s1917_s21 + $0x40] ss:$8 sps:$4 sm:$0xff]  }
  0x1d   : > { %746 = vmatpush1.bf16.msra.mxu0 %v1705_v4  ;;  %1670 = vmatpush1.bf16.msra.mxu1 %v1705_v4  ;;  %v1761_v33 = vld [vmem:[%s1917_s21 + $0x144] ss:$8 sps:$4 sm:$0xff]   ;;  %v1763_v35 = vld [vmem:[%s1917_s21 + $0x140] ss:$8 sps:$4 sm:$0xff]   ;;  %v1728_v36 = vld [vmem:[%s1917_s21 + $0x54] ss:$8 sps:$4 sm:$0xff]  }
  0x1e   : > { %747 = vmatprep.subr.bf16.mxu0 %v1874_v2  ;;  %1661 = vmatprep.subr.bf16.mxu1 %v1874_v2  ;;  %v1767_v37 = vld [vmem:[%s1917_s21 + $0x154] ss:$8 sps:$4 sm:$0xff]   ;;  %v1730_v38 = vld [vmem:[%s1917_s21 + $0x50] ss:$8 sps:$4 sm:$0xff]   ;;  %v1731_v40 = vld [vmem:[%s1917_s21 + $0x64] ss:$8 sps:$4 sm:$0xff]  }
  0x1f   : > { %v1769_v39 = vld [vmem:[%s1917_s21 + $0x150] ss:$8 sps:$4 sm:$0xff]   ;;  %v1773_v41 = vld [vmem:[%s1917_s21 + $0x164] ss:$8 sps:$4 sm:$0xff]   ;;  %v1733_v42 = vld [vmem:[%s1917_s21 + $0x60] ss:$8 sps:$4 sm:$0xff]  }
  0x20   : > { %v1775_v43 = vld [vmem:[%s1917_s21 + $0x160] ss:$8 sps:$4 sm:$0xff]   ;;  %v1734_v44 = vld [vmem:[%s1917_s21 + $0x74] ss:$8 sps:$4 sm:$0xff]   ;;  %v1736_v46 = vld [vmem:[%s1917_s21 + $0x70] ss:$8 sps:$4 sm:$0xff]  }
  0x21   : > { %748 = vmatpush1.bf16.msra.mxu0 %v1706_v5  ;;  %1671 = vmatpush1.bf16.msra.mxu1 %v1706_v5  ;;  %v1779_v45 = vld [vmem:[%s1917_s21 + $0x174] ss:$8 sps:$4 sm:$0xff]   ;;  %v1781_v47 = vld [vmem:[%s1917_s21 + $0x170] ss:$8 sps:$4 sm:$0xff]   ;;  %v1740_v48 = vld [vmem:[%s1917_s21 + $0x84] ss:$8 sps:$4 sm:$0xff]  }
  0x22   : > { %749 = vmatprep.subr.bf16.mxu0 %v1874_v2  ;;  %1662 = vmatprep.subr.bf16.mxu1 %v1874_v2  ;;  %v1785_v49 = vld [vmem:[%s1917_s21 + $0x184] ss:$8 sps:$4 sm:$0xff]   ;;  %v1742_v50 = vld [vmem:[%s1917_s21 + $0x80] ss:$8 sps:$4 sm:$0xff]   ;;  %v1746_v52 = vld [vmem:[%s1917_s21 + $0x94] ss:$8 sps:$4 sm:$0xff]  }
  0x23   : > { %v1787_v51 = vld [vmem:[%s1917_s21 + $0x180] ss:$8 sps:$4 sm:$0xff]   ;;  %v1788_v53 = vld [vmem:[%s1917_s21 + $0x194] ss:$8 sps:$4 sm:$0xff]   ;;  %v1748_v54 = vld [vmem:[%s1917_s21 + $0x90] ss:$8 sps:$4 sm:$0xff]  }
  0x24   : > { %v1790_v55 = vld [vmem:[%s1917_s21 + $0x190] ss:$8 sps:$4 sm:$0xff]   ;;  %v1752_v56 = vld [vmem:[%s1917_s21 + $0xa4] ss:$8 sps:$4 sm:$0xff]   ;;  %v1754_v58 = vld [vmem:[%s1917_s21 + $0xa0] ss:$8 sps:$4 sm:$0xff]  }
  0x25   : > { %750 = vmatpush1.bf16.msra.mxu0 %v1707_v7  ;;  %1672 = vmatpush1.bf16.msra.mxu1 %v1707_v7  ;;  %v1791_v57 = vld [vmem:[%s1917_s21 + $0x1a4] ss:$8 sps:$4 sm:$0xff]   ;;  %v1793_v59 = vld [vmem:[%s1917_s21 + $0x1a0] ss:$8 sps:$4 sm:$0xff]   ;;  %v1758_v60 = vld [vmem:[%s1917_s21 + $0xb4] ss:$8 sps:$4 sm:$0xff]  }
  0x26   : > { %751 = vmatprep.subr.bf16.mxu0 %v1874_v2  ;;  %1663 = vmatprep.subr.bf16.mxu1 %v1874_v2  ;;  %v1794_v61 = vld [vmem:[%s1917_s21 + $0x1b4] ss:$8 sps:$4 sm:$0xff]   ;;  %v1760_v62 = vld [vmem:[%s1917_s21 + $0xb0] ss:$8 sps:$4 sm:$0xff]   ;;  %v1764_v0 = vld [vmem:[%s1917_s21 + $0xc4] ss:$8 sps:$4 sm:$0xff]  }
  0x27   : > { %v1796_v63 = vld [vmem:[%s1917_s21 + $0x1b0] ss:$8 sps:$4 sm:$0xff]   ;;  %v1797_v1 = vld [vmem:[%s1917_s21 + $0x1c4] ss:$8 sps:$4 sm:$0xff]   ;;  %v1799_v3 = vld [vmem:[%s1917_s21 + $0x1c0] ss:$8 sps:$4 sm:$0xff]  }
  0x28   : > { %v1770_v4 = vld [vmem:[%s1917_s21 + $0xd4] ss:$8 sps:$4 sm:$0xff]   ;;  %v1772_v6 = vld [vmem:[%s1917_s21 + $0xd0] ss:$8 sps:$4 sm:$0xff]   ;;  %v1803_v9 = vld [vmem:[%s1917_s21 + $0x1e4] ss:$8 sps:$4 sm:$0xff]  }
  0x29   : > { %752 = vmatpush1.bf16.msra.mxu0 %v1708_v8  ;;  %1673 = vmatpush1.bf16.msra.mxu1 %v1708_v8  ;;  %v1800_v5 = vld [vmem:[%s1917_s21 + $0x1d4] ss:$8 sps:$4 sm:$0xff]   ;;  %v1802_v7 = vld [vmem:[%s1917_s21 + $0x1d0] ss:$8 sps:$4 sm:$0xff]   ;;  %v1776_v8 = vld [vmem:[%s1917_s21 + $0xe4] ss:$8 sps:$4 sm:$0xff]  }
  0x2a   : > { %753 = vmatprep.subr.bf16.mxu0 %v1874_v2  ;;  %1664 = vmatprep.subr.bf16.mxu1 %v1874_v2  ;;  %v1805_v11 = vld [vmem:[%s1917_s21 + $0x1e0] ss:$8 sps:$4 sm:$0xff]   ;;  %v1782_v12 = vld [vmem:[%s1917_s21 + $0xf4] ss:$8 sps:$4 sm:$0xff]   ;;  %v1784_v14 = vld [vmem:[%s1917_s21 + $0xf0] ss:$8 sps:$4 sm:$0xff]  }
  0x2b   : > { %v1808_v15 = vld [vmem:[%s1917_s21 + $0x1f0] ss:$8 sps:$4 sm:$0xff]  }
  0x2d   : > { %754 = vmatpush1.bf16.msra.mxu0 %v1709_v10  ;;  %1674 = vmatpush1.bf16.msra.mxu1 %v1709_v10  ;;  %v1778_v10 = vld [vmem:[%s1917_s21 + $0xe0] ss:$8 sps:$4 sm:$0xff]  }
  0x2e   : > { %755 = vmatprep.subr.bf16.mxu0 %v1874_v2  ;;  %1665 = vmatprep.subr.bf16.mxu1 %v1874_v2 }
  0x31   : > { %756 = vmatpush1.bf16.msra.mxu0 %v1710_v13  ;;  %1675 = vmatpush1.bf16.msra.mxu1 %v1710_v13  ;;  %v1806_v13 = vld [vmem:[%s1917_s21 + $0x1f4] ss:$8 sps:$4 sm:$0xff]  }
  0x32   : > { %769 = vmatprep.subr.bf16.mxu0 %v1874_v2  ;;  %1666 = vmatprep.subr.bf16.mxu1 %v1874_v2 }
  0x35   : > { %770 = vmatpush2.bf16.msra.mxu0 %v739_v16  ;;  %1676 = vmatpush2.bf16.msra.mxu1 %v739_v16 }
  0x36   : > { %771 = vmatprep.subr.bf16.mxu0 %v1874_v2  ;;  %1667 = vmatprep.subr.bf16.mxu1 %v1874_v2  ;;  %v1766_v2 = vld [vmem:[%s1917_s21 + $0xc0] ss:$8 sps:$4 sm:$0xff]   ;;  %s1876_s21 = smov [#allocation2]  }
  0x37   : > { %s1448_s22 = sshll.u32 %s1876_s21, 4  ;;  %s1449_s22 = int_to_ptr.vmem [resolvable:$true] %s1448_s22 }
  0x38   : > { %s1809_s25 = scalar_lea.vmem %s1449_s22, 16  ;;  %s1815_s26 = scalar_lea.vmem %s1449_s22, 32 }
  0x39   : > { %772 = vmatpush2.bf16.msra.mxu0 %v1712_v17  ;;  %1677 = vmatpush2.bf16.msra.mxu1 %v1712_v17  ;;  %p1810_p6 = scmp.ne.s32.totalorder %s1449_s22, %s1809_s25  ;;  %p1816_p9 = scmp.lt.s32.totalorder %s1449_s22, %s1449_s22 }
  0x3a   : > { %p1817_p10 = scmp.lt.s32.totalorder %s1815_s26, %s1809_s25 }
  0x3b   : > { %p1811_p7 = pnand %p1810_p6, %p1686_p5 }
  0x3c   : > { %774 = vmatmul.mubr.bf16.vlgmr.msra.gmra.mxu0 %v1713_v18  ;;  %902 = vmatmul.mubr.bf16.vlgmr.msra.gmra.mxu1 %v1737_v19  ;;  %p1818_p11 = por %p1817_p10, %p1816_p9 }
  0x3d   : > { %1620 = vmatprep.mubr.msk.bf16.mxu0 %vm637_vm1, %v1716_v20  ;;  %1636 = vmatprep.mubr.msk.bf16.mxu1 %vm637_vm1, %v1743_v21  ;;  %p1812_p8 = pneg %p1811_p7 }
  0x3f   : > { %p1819_p12 = pnand %p1818_p11, %p1812_p8 }
  0x44   : > { %782 = vmatmul.mubr.bf16.gmra.mxu0 %v1718_v22  ;;  %910 = vmatmul.mubr.bf16.gmra.mxu1 %v1745_v23 }
  0x45   : > { %1621 = vmatprep.mubr.msk.bf16.mxu0 %vm637_vm1, %v1719_v24  ;;  %1637 = vmatprep.mubr.msk.bf16.mxu1 %vm637_vm1, %v1749_v25 }
  0x4c   : > { %790 = vmatmul.mubr.bf16.gmra.mxu0 %v1721_v26  ;;  %918 = vmatmul.mubr.bf16.gmra.mxu1 %v1751_v27 }
  0x4d   : > { %1622 = vmatprep.mubr.msk.bf16.mxu0 %vm637_vm1, %v1722_v28  ;;  %1638 = vmatprep.mubr.msk.bf16.mxu1 %vm637_vm1, %v1755_v29 }
  0x54   : > { %798 = vmatmul.mubr.bf16.gmra.mxu0 %v1724_v30  ;;  %926 = vmatmul.mubr.bf16.gmra.mxu1 %v1757_v31 }
  0x55   : > { %1623 = vmatprep.mubr.msk.bf16.mxu0 %vm637_vm1, %v1725_v32  ;;  %1639 = vmatprep.mubr.msk.bf16.mxu1 %vm637_vm1, %v1761_v33 }
  0x5c   : > { %806 = vmatmul.mubr.bf16.gmra.mxu0 %v1727_v34  ;;  %934 = vmatmul.mubr.bf16.gmra.mxu1 %v1763_v35 }
  0x5d   : > { %1624 = vmatprep.mubr.msk.bf16.mxu0 %vm637_vm1, %v1728_v36  ;;  %1640 = vmatprep.mubr.msk.bf16.mxu1 %vm637_vm1, %v1767_v37 }
  0x64   : > { %814 = vmatmul.mubr.bf16.gmra.mxu0 %v1730_v38  ;;  %942 = vmatmul.mubr.bf16.gmra.mxu1 %v1769_v39 }
  0x65   : > { %1625 = vmatprep.mubr.msk.bf16.mxu0 %vm637_vm1, %v1731_v40  ;;  %1641 = vmatprep.mubr.msk.bf16.mxu1 %vm637_vm1, %v1773_v41 }
  0x6c   : > { %822 = vmatmul.mubr.bf16.gmra.mxu0 %v1733_v42  ;;  %950 = vmatmul.mubr.bf16.gmra.mxu1 %v1775_v43 }
  0x6d   : > { %1626 = vmatprep.mubr.msk.bf16.mxu0 %vm637_vm1, %v1734_v44  ;;  %1642 = vmatprep.mubr.msk.bf16.mxu1 %vm637_vm1, %v1779_v45 }
  0x74   : > { %830 = vmatmul.mubr.bf16.gmra.mxu0 %v1736_v46  ;;  %958 = vmatmul.mubr.bf16.gmra.mxu1 %v1781_v47 }
  0x75   : > { %1627 = vmatprep.mubr.msk.bf16.mxu0 %vm637_vm1, %v1740_v48  ;;  %1643 = vmatprep.mubr.msk.bf16.mxu1 %vm637_vm1, %v1785_v49 }
  0x7c   : > { %838 = vmatmul.mubr.bf16.gmra.mxu0 %v1742_v50  ;;  %966 = vmatmul.mubr.bf16.gmra.mxu1 %v1787_v51 }
  0x7d   : > { %1628 = vmatprep.mubr.msk.bf16.mxu0 %vm637_vm1, %v1746_v52  ;;  %1644 = vmatprep.mubr.msk.bf16.mxu1 %vm637_vm1, %v1788_v53 }
  0x84   : > { %846 = vmatmul.mubr.bf16.gmra.mxu0 %v1748_v54  ;;  %974 = vmatmul.mubr.bf16.gmra.mxu1 %v1790_v55 }
  0x85   : > { %1629 = vmatprep.mubr.msk.bf16.mxu0 %vm637_vm1, %v1752_v56  ;;  %1645 = vmatprep.mubr.msk.bf16.mxu1 %vm637_vm1, %v1791_v57 }
  0x8c   : > { %854 = vmatmul.mubr.bf16.gmra.mxu0 %v1754_v58  ;;  %982 = vmatmul.mubr.bf16.gmra.mxu1 %v1793_v59 }
  0x8d   : > { %1630 = vmatprep.mubr.msk.bf16.mxu0 %vm637_vm1, %v1758_v60  ;;  %1646 = vmatprep.mubr.msk.bf16.mxu1 %vm637_vm1, %v1794_v61 }
  0x94   : > { %862 = vmatmul.mubr.bf16.gmra.mxu0 %v1760_v62  ;;  %990 = vmatmul.mubr.bf16.gmra.mxu1 %v1796_v63 }
  0x95   : > { %1631 = vmatprep.mubr.msk.bf16.mxu0 %vm637_vm1, %v1764_v0  ;;  %1647 = vmatprep.mubr.msk.bf16.mxu1 %vm637_vm1, %v1797_v1 }
  0x9c   : > { %870 = vmatmul.mubr.bf16.gmra.mxu0 %v1766_v2  ;;  %998 = vmatmul.mubr.bf16.gmra.mxu1 %v1799_v3 }
  0x9d   : > { %1632 = vmatprep.mubr.msk.bf16.mxu0 %vm637_vm1, %v1770_v4  ;;  %1648 = vmatprep.mubr.msk.bf16.mxu1 %vm637_vm1, %v1800_v5 }
  0xa4   : > { %878 = vmatmul.mubr.bf16.gmra.mxu0 %v1772_v6  ;;  %1006 = vmatmul.mubr.bf16.gmra.mxu1 %v1802_v7 }
  0xa5   : > { %1633 = vmatprep.mubr.msk.bf16.mxu0 %vm637_vm1, %v1776_v8  ;;  %1649 = vmatprep.mubr.msk.bf16.mxu1 %vm637_vm1, %v1803_v9 }
  0xac   : > { %886 = vmatmul.mubr.bf16.gmra.mxu0 %v1778_v10  ;;  %1014 = vmatmul.mubr.bf16.gmra.mxu1 %v1805_v11 }
  0xad   : > { %1634 = vmatprep.mubr.msk.bf16.mxu0 %vm637_vm1, %v1782_v12  ;;  %1650 = vmatprep.mubr.msk.bf16.mxu1 %vm637_vm1, %v1806_v13 }
  0xb4   : > { %894 = vmatmul.mubr.bf16.gmra.mxu0 %v1784_v14  ;;  %1022 = vmatmul.mubr.bf16.gmra.mxu1 %v1808_v15 }
  0xfc   : > { %v2051_v16 = vpop.f32.mrf.mxu0  ;;  %v2053_v17 = vpop.f32.mrf.mxu1 }
  0xfd   : > { %1031 = vst.msk [vmem:[%s1922_s24] sm:$0xff] %vm1030_vm4, %v2051_v16  ;;  %1063 = vst.msk [vmem:[%s1922_s24 + $0x100] sm:$0xff] %vm1030_vm4, %v2053_v17 }
  0xfe   : > { %v777_v18 = vpop.f32.mrf.mxu0  ;;  %v905_v19 = vpop.f32.mrf.mxu1 }
  0xff   : > { %v1233_v19 = vmul.f32 %v2051_v16, %v2051_v16 }
 0x100   : > { %v2061_v20 = vpop.f32.mrf.mxu0  ;;  %v2063_v21 = vpop.f32.mrf.mxu1 }
 0x101   : > { %1032 = vst.msk [vmem:[%s1922_s24 + $0x8] sm:$0xff] %vm1030_vm4, %v2061_v20  ;;  %1064 = vst.msk [vmem:[%s1922_s24 + $0x108] sm:$0xff] %vm1030_vm4, %v2063_v21  ;;  %v1234_v14 = vmul.f32 %v2061_v20, %v2061_v20 }
 0x102   : > { %v780_v22 = vpop.f32.mrf.mxu0  ;;  %v908_v23 = vpop.f32.mrf.mxu1 }
 0x103   : > { %v1097_v22 = vsel %vm1030_vm4, %v2061_v20, 0.0 }
 0x104   : > { %v2071_v24 = vpop.f32.mrf.mxu0  ;;  %v2073_v25 = vpop.f32.mrf.mxu1 }
 0x105   : > { %1033 = vst.msk [vmem:[%s1922_s24 + $0x10] sm:$0xff] %vm1030_vm4, %v2071_v24  ;;  %1065 = vst.msk [vmem:[%s1922_s24 + $0x110] sm:$0xff] %vm1030_vm4, %v2073_v25  ;;  %v1235_v23 = vmul.f32 %v2071_v24, %v2071_v24 }
 0x106   : > { %v785_v26 = vpop.f32.mrf.mxu0  ;;  %v913_v27 = vpop.f32.mrf.mxu1 }
 0x108   : > { %v2081_v28 = vpop.f32.mrf.mxu0  ;;  %v2083_v29 = vpop.f32.mrf.mxu1 }
 0x109   : > { %1034 = vst.msk [vmem:[%s1922_s24 + $0x18] sm:$0xff] %vm1030_vm4, %v2081_v28  ;;  %1066 = vst.msk [vmem:[%s1922_s24 + $0x118] sm:$0xff] %vm1030_vm4, %v2083_v29 }
 0x10a   : > { %v788_v30 = vpop.f32.mrf.mxu0  ;;  %v916_v31 = vpop.f32.mrf.mxu1 }
 0x10b   : > { %v1096_v30 = vsel %vm1030_vm4, %v2051_v16, 0.0  ;;  %v1298_v31 = vsel %vm1030_vm4, %v1234_v14, 0.0  ;;  %v1297_v16 = vsel %vm1030_vm4, %v1233_v19, 0.0 }
 0x10c   : > { %v2091_v32 = vpop.f32.mrf.mxu0  ;;  %v2093_v33 = vpop.f32.mrf.mxu1  ;;  %v1098_v20 = vadd.f32 %v1097_v22, %v1096_v30 }
 0x10d   : > { %1035 = vst.msk [vmem:[%s1922_s24 + $0x20] sm:$0xff] %vm1030_vm4, %v2091_v32  ;;  %1067 = vst.msk [vmem:[%s1922_s24 + $0x120] sm:$0xff] %vm1030_vm4, %v2093_v33 }
 0x10e   : > { %v793_v34 = vpop.f32.mrf.mxu0  ;;  %v921_v35 = vpop.f32.mrf.mxu1 }
 0x10f   : > { %v1099_v34 = vsel %vm1030_vm4, %v2071_v24, 0.0  ;;  %v1236_v35 = vmul.f32 %v2081_v28, %v2081_v28  ;;  %v1101_v24 = vsel %vm1030_vm4, %v2081_v28, 0.0 }
 0x110   : > { %v2101_v36 = vpop.f32.mrf.mxu0  ;;  %v2103_v37 = vpop.f32.mrf.mxu1 }
 0x111   : > { %1036 = vst.msk [vmem:[%s1922_s24 + $0x28] sm:$0xff] %vm1030_vm4, %v2101_v36  ;;  %1068 = vst.msk [vmem:[%s1922_s24 + $0x128] sm:$0xff] %vm1030_vm4, %v2103_v37 }
 0x112   : > { %v796_v38 = vpop.f32.mrf.mxu0  ;;  %v924_v39 = vpop.f32.mrf.mxu1 }
 0x114   : > { %v2111_v40 = vpop.f32.mrf.mxu0  ;;  %v2113_v41 = vpop.f32.mrf.mxu1 }
 0x115   : > { %1037 = vst.msk [vmem:[%s1922_s24 + $0x30] sm:$0xff] %vm1030_vm4, %v2111_v40  ;;  %1069 = vst.msk [vmem:[%s1922_s24 + $0x130] sm:$0xff] %vm1030_vm4, %v2113_v41 }
 0x116   : > { %v801_v42 = vpop.f32.mrf.mxu0  ;;  %v929_v43 = vpop.f32.mrf.mxu1 }
 0x117   : > { %v1300_v42 = vsel %vm1030_vm4, %v1235_v23, 0.0  ;;  %v1237_v43 = vmul.f32 %v2091_v32, %v2091_v32 }
 0x118   : > { %v2121_v44 = vpop.f32.mrf.mxu0  ;;  %v2123_v45 = vpop.f32.mrf.mxu1 }
 0x119   : > { %1038 = vst.msk [vmem:[%s1922_s24 + $0x38] sm:$0xff] %vm1030_vm4, %v2121_v44  ;;  %1070 = vst.msk [vmem:[%s1922_s24 + $0x138] sm:$0xff] %vm1030_vm4, %v2123_v45 }
 0x11a   : > { %v804_v46 = vpop.f32.mrf.mxu0  ;;  %v932_v47 = vpop.f32.mrf.mxu1 }
 0x11b   : > { %v1299_v46 = vadd.f32 %v1298_v31, %v1297_v16  ;;  %v1100_v47 = vadd.f32 %v1099_v34, %v1098_v20 }
 0x11c   : > { %v2131_v48 = vpop.f32.mrf.mxu0  ;;  %v2133_v49 = vpop.f32.mrf.mxu1 }
 0x11d   : > { %1039 = vst.msk [vmem:[%s1922_s24 + $0x40] sm:$0xff] %vm1030_vm4, %v2131_v48  ;;  %1071 = vst.msk [vmem:[%s1922_s24 + $0x140] sm:$0xff] %vm1030_vm4, %v2133_v49  ;;  %v1301_v28 = vadd.f32 %v1300_v42, %v1299_v46  ;;  %v1241_v31 = vmul.f32 %v2131_v48, %v2131_v48  ;;  %v1111_v16 = vsel %vm1030_vm4, %v2131_v48, 0.0 }
 0x11e   : > { %v809_v50 = vpop.f32.mrf.mxu0  ;;  %v937_v51 = vpop.f32.mrf.mxu1 }
 0x120   : > { %v2141_v52 = vpop.f32.mrf.mxu0  ;;  %v2143_v53 = vpop.f32.mrf.mxu1 }
 0x121   : > { %1040 = vst.msk [vmem:[%s1922_s24 + $0x48] sm:$0xff] %vm1030_vm4, %v2141_v52  ;;  %1072 = vst.msk [vmem:[%s1922_s24 + $0x148] sm:$0xff] %vm1030_vm4, %v2143_v53  ;;  %v1242_v42 = vmul.f32 %v2141_v52, %v2141_v52  ;;  %v1113_v48 = vsel %vm1030_vm4, %v2141_v52, 0.0 }
 0x122   : > { %v812_v54 = vpop.f32.mrf.mxu0  ;;  %v940_v55 = vpop.f32.mrf.mxu1 }
 0x123   : > { %v1302_v54 = vsel %vm1030_vm4, %v1236_v35, 0.0  ;;  %v1103_v55 = vsel %vm1030_vm4, %v2091_v32, 0.0  ;;  %v1105_v32 = vsel %vm1030_vm4, %v2101_v36, 0.0 }
 0x124   : > { %v2151_v56 = vpop.f32.mrf.mxu0  ;;  %v2153_v57 = vpop.f32.mrf.mxu1 }
 0x125   : > { %1041 = vst.msk [vmem:[%s1922_s24 + $0x50] sm:$0xff] %vm1030_vm4, %v2151_v56  ;;  %1073 = vst.msk [vmem:[%s1922_s24 + $0x150] sm:$0xff] %vm1030_vm4, %v2153_v57 }
 0x126   : > { %v817_v58 = vpop.f32.mrf.mxu0  ;;  %v945_v59 = vpop.f32.mrf.mxu1 }
 0x127   : > { %v1238_v58 = vmul.f32 %v2101_v36, %v2101_v36  ;;  %v1102_v59 = vadd.f32 %v1101_v24, %v1100_v47  ;;  %v1312_v47 = vsel %vm1030_vm4, %v1241_v31, 0.0 }
 0x128   : > { %v2161_v60 = vpop.f32.mrf.mxu0  ;;  %v2163_v61 = vpop.f32.mrf.mxu1 }
 0x129   : > { %1042 = vst.msk [vmem:[%s1922_s24 + $0x58] sm:$0xff] %vm1030_vm4, %v2161_v60  ;;  %1074 = vst.msk [vmem:[%s1922_s24 + $0x158] sm:$0xff] %vm1030_vm4, %v2163_v61  ;;  %v1306_v14 = vsel %vm1030_vm4, %v1238_v58, 0.0 }
 0x12a   : > { %v820_v62 = vpop.f32.mrf.mxu0  ;;  %v948_v63 = vpop.f32.mrf.mxu1 }
 0x12c   : > { %v2171_v0 = vpop.f32.mrf.mxu0  ;;  %v2173_v1 = vpop.f32.mrf.mxu1 }
 0x12d   : > { %1043 = vst.msk [vmem:[%s1922_s24 + $0x60] sm:$0xff] %vm1030_vm4, %v2171_v0  ;;  %1075 = vst.msk [vmem:[%s1922_s24 + $0x160] sm:$0xff] %vm1030_vm4, %v2173_v1 }
 0x12e   : > { %v825_v2 = vpop.f32.mrf.mxu0  ;;  %v953_v3 = vpop.f32.mrf.mxu1 }
 0x12f   : > { %v1304_v2 = vsel %vm1030_vm4, %v1237_v43, 0.0  ;;  %v1239_v3 = vmul.f32 %v2111_v40, %v2111_v40 }
 0x130   : > { %v2181_v4 = vpop.f32.mrf.mxu0  ;;  %v2183_v5 = vpop.f32.mrf.mxu1 }
 0x131   : > { %1044 = vst.msk [vmem:[%s1922_s24 + $0x68] sm:$0xff] %vm1030_vm4, %v2181_v4  ;;  %1076 = vst.msk [vmem:[%s1922_s24 + $0x168] sm:$0xff] %vm1030_vm4, %v2183_v5  ;;  %v1308_v30 = vsel %vm1030_vm4, %v1239_v3, 0.0 }
 0x132   : > { %v828_v6 = vpop.f32.mrf.mxu0  ;;  %v956_v7 = vpop.f32.mrf.mxu1 }
 0x133   : > { %v1303_v6 = vadd.f32 %v1302_v54, %v1301_v28  ;;  %v1104_v7 = vadd.f32 %v1103_v55, %v1102_v59  ;;  %v1243_v54 = vmul.f32 %v2151_v56, %v2151_v56 }
 0x134   : > { %v2191_v8 = vpop.f32.mrf.mxu0  ;;  %v2193_v9 = vpop.f32.mrf.mxu1 }
 0x135   : > { %1045 = vst.msk [vmem:[%s1922_s24 + $0x70] sm:$0xff] %vm1030_vm4, %v2191_v8  ;;  %1077 = vst.msk [vmem:[%s1922_s24 + $0x170] sm:$0xff] %vm1030_vm4, %v2193_v9  ;;  %v1305_v36 = vadd.f32 %v1304_v2, %v1303_v6  ;;  %v1106_v19 = vadd.f32 %v1105_v32, %v1104_v7  ;;  %v1244_v2 = vmul.f32 %v2161_v60, %v2161_v60  ;;  %v1316_v7 = vsel %vm1030_vm4, %v1243_v54, 0.0 }
 0x136   : > { %v833_v10 = vpop.f32.mrf.mxu0  ;;  %v961_v11 = vpop.f32.mrf.mxu1 }
 0x137   : > { %v1307_v34 = vadd.f32 %v1306_v14, %v1305_v36  ;;  %v1245_v14 = vmul.f32 %v2171_v0, %v2171_v0 }
 0x138   : > { %v2201_v12 = vpop.f32.mrf.mxu0  ;;  %v2203_v13 = vpop.f32.mrf.mxu1 }
 0x139   : > { %1046 = vst.msk [vmem:[%s1922_s24 + $0x78] sm:$0xff] %vm1030_vm4, %v2201_v12  ;;  %1078 = vst.msk [vmem:[%s1922_s24 + $0x178] sm:$0xff] %vm1030_vm4, %v2203_v13 }
 0x13a   : > { %v836_v15 = vpop.f32.mrf.mxu0  ;;  %v964_v18 = vpop.f32.mrf.mxu1 }
 0x13b   : > { %v1107_v15 = vsel %vm1030_vm4, %v2111_v40, 0.0  ;;  %v1240_v18 = vmul.f32 %v2121_v44, %v2121_v44  ;;  %v1109_v40 = vsel %vm1030_vm4, %v2121_v44, 0.0  ;;  %v1309_v44 = vadd.f32 %v1308_v30, %v1307_v34 }
 0x13c   : > { %v2219_v26 = vpop.f32.mrf.mxu0  ;;  %v2221_v27 = vpop.f32.mrf.mxu1  ;;  %v1108_v35 = vadd.f32 %v1107_v15, %v1106_v19  ;;  %v1246_v30 = vmul.f32 %v2181_v4, %v2181_v4 }
 0x13d   : > { %1047 = vst.msk [vmem:[%s1922_s24 + $0x80] sm:$0xff] %vm1030_vm4, %v2219_v26  ;;  %1079 = vst.msk [vmem:[%s1922_s24 + $0x180] sm:$0xff] %vm1030_vm4, %v2221_v27 }
 0x13e   : > { %v841_v38 = vpop.f32.mrf.mxu0  ;;  %v969_v39 = vpop.f32.mrf.mxu1  ;;  %v1110_v24 = vadd.f32 %v1109_v40, %v1108_v35  ;;  %v1320_v35 = vsel %vm1030_vm4, %v1245_v14, 0.0 }
 0x13f   : > { %v1310_v39 = vsel %vm1030_vm4, %v1240_v18, 0.0 }
 0x140   : > { %v2242_v50 = vpop.f32.mrf.mxu0  ;;  %v2244_v51 = vpop.f32.mrf.mxu1  ;;  %v1311_v55 = vadd.f32 %v1310_v39, %v1309_v44  ;;  %v1112_v58 = vadd.f32 %v1111_v16, %v1110_v24  ;;  %v1247_v39 = vmul.f32 %v2191_v8, %v2191_v8 }
 0x141   : > { %1048 = vst.msk [vmem:[%s1922_s24 + $0x88] sm:$0xff] %vm1030_vm4, %v2242_v50  ;;  %1080 = vst.msk [vmem:[%s1922_s24 + $0x188] sm:$0xff] %vm1030_vm4, %v2244_v51 }
 0x142   : > { %v844_v62 = vpop.f32.mrf.mxu0  ;;  %v972_v63 = vpop.f32.mrf.mxu1  ;;  %v1313_v52 = vadd.f32 %v1312_v47, %v1311_v55  ;;  %v1114_v32 = vadd.f32 %v1113_v48, %v1112_v58  ;;  %v1248_v47 = vmul.f32 %v2201_v12, %v2201_v12  ;;  %v1324_v58 = vsel %vm1030_vm4, %v1247_v39, 0.0 }
 0x143   : > { %v1314_v62 = vsel %vm1030_vm4, %v1242_v42, 0.0  ;;  %v1115_v63 = vsel %vm1030_vm4, %v2151_v56, 0.0  ;;  %v1117_v56 = vsel %vm1030_vm4, %v2161_v60, 0.0 }
 0x144   : > { %v2262_v10 = vpop.f32.mrf.mxu0  ;;  %v2264_v11 = vpop.f32.mrf.mxu1  ;;  %v1315_v15 = vadd.f32 %v1314_v62, %v1313_v52  ;;  %v1116_v18 = vadd.f32 %v1115_v63, %v1114_v32  ;;  %v1249_v62 = vmul.f32 %v2219_v26, %v2219_v26 }
 0x145   : > { %1049 = vst.msk [vmem:[%s1922_s24 + $0x90] sm:$0xff] %vm1030_vm4, %v2262_v10  ;;  %1081 = vst.msk [vmem:[%s1922_s24 + $0x190] sm:$0xff] %vm1030_vm4, %v2264_v11 }
 0x146   : > { %v849_v22 = vpop.f32.mrf.mxu0  ;;  %v977_v23 = vpop.f32.mrf.mxu1  ;;  %v1317_v60 = vadd.f32 %v1316_v7, %v1315_v15  ;;  %v1118_v40 = vadd.f32 %v1117_v56, %v1116_v18  ;;  %v1250_v7 = vmul.f32 %v2242_v50, %v2242_v50  ;;  %v1328_v18 = vsel %vm1030_vm4, %v1249_v62, 0.0 }
 0x147   : > { %v1318_v22 = vsel %vm1030_vm4, %v1244_v2, 0.0  ;;  %v1119_v23 = vsel %vm1030_vm4, %v2171_v0, 0.0  ;;  %v1121_v0 = vsel %vm1030_vm4, %v2181_v4, 0.0 }
 0x148   : > { %v2282_v20 = vpop.f32.mrf.mxu0  ;;  %v2284_v38 = vpop.f32.mrf.mxu1  ;;  %v1319_v16 = vadd.f32 %v1318_v22, %v1317_v60  ;;  %v1120_v42 = vadd.f32 %v1119_v23, %v1118_v40  ;;  %v1129_v22 = vsel %vm1030_vm4, %v2242_v50, 0.0 }
 0x149   : > { %1050 = vst.msk [vmem:[%s1922_s24 + $0x98] sm:$0xff] %vm1030_vm4, %v2282_v20  ;;  %1082 = vst.msk [vmem:[%s1922_s24 + $0x198] sm:$0xff] %vm1030_vm4, %v2284_v38 }
 0x14a   : > { %v852_v43 = vpop.f32.mrf.mxu0  ;;  %v980_v46 = vpop.f32.mrf.mxu1  ;;  %v1321_v4 = vadd.f32 %v1320_v35, %v1319_v16  ;;  %v1122_v48 = vadd.f32 %v1121_v0, %v1120_v42  ;;  %v1252_v35 = vmul.f32 %v2282_v20, %v2282_v20 }
 0x14b   : > { %v1322_v43 = vsel %vm1030_vm4, %v1246_v30, 0.0  ;;  %v1123_v46 = vsel %vm1030_vm4, %v2191_v8, 0.0  ;;  %v1125_v8 = vsel %vm1030_vm4, %v2201_v12, 0.0 }
 0x14c   : > { %v2302_v28 = vpop.f32.mrf.mxu0  ;;  %v2304_v59 = vpop.f32.mrf.mxu1  ;;  %v1323_v63 = vadd.f32 %v1322_v43, %v1321_v4  ;;  %v1124_v2 = vadd.f32 %v1123_v46, %v1122_v48  ;;  %v1133_v43 = vsel %vm1030_vm4, %v2282_v20, 0.0 }
 0x14d   : > { %1051 = vst.msk [vmem:[%s1922_s24 + $0xa0] sm:$0xff] %vm1030_vm4, %v2302_v28  ;;  %1083 = vst.msk [vmem:[%s1922_s24 + $0x1a0] sm:$0xff] %vm1030_vm4, %v2304_v59 }
 0x14e   : > { %v857_v3 = vpop.f32.mrf.mxu0  ;;  %v985_v6 = vpop.f32.mrf.mxu1  ;;  %v1325_v12 = vadd.f32 %v1324_v58, %v1323_v63  ;;  %v1126_v56 = vadd.f32 %v1125_v8, %v1124_v2 }
 0x14f   : > { %v1326_v3 = vsel %vm1030_vm4, %v1248_v47, 0.0  ;;  %v1127_v6 = vsel %vm1030_vm4, %v2219_v26, 0.0  ;;  %v1251_v26 = vmul.f32 %v2262_v10, %v2262_v10 }
 0x150   : > { %v2322_v36 = vpop.f32.mrf.mxu0  ;;  %v2324_v19 = vpop.f32.mrf.mxu1  ;;  %v1327_v23 = vadd.f32 %v1326_v3, %v1325_v12  ;;  %v1128_v30 = vadd.f32 %v1127_v6, %v1126_v56 }
 0x151   : > { %1052 = vst.msk [vmem:[%s1922_s24 + $0xa8] sm:$0xff] %vm1030_vm4, %v2322_v36  ;;  %1084 = vst.msk [vmem:[%s1922_s24 + $0x1a8] sm:$0xff] %vm1030_vm4, %v2324_v19  ;;  %v1332_v42 = vsel %vm1030_vm4, %v1251_v26, 0.0  ;;  %v1254_v58 = vmul.f32 %v2322_v36, %v2322_v36  ;;  %v1137_v3 = vsel %vm1030_vm4, %v2322_v36, 0.0 }
 0x152   : > { %v860_v31 = vpop.f32.mrf.mxu0  ;;  %v988_v34 = vpop.f32.mrf.mxu1  ;;  %v1329_v50 = vadd.f32 %v1328_v18, %v1327_v23  ;;  %v1130_v0 = vadd.f32 %v1129_v22, %v1128_v30 }
 0x153   : > { %v1330_v31 = vsel %vm1030_vm4, %v1250_v7, 0.0  ;;  %v1131_v34 = vsel %vm1030_vm4, %v2262_v10, 0.0  ;;  %v1253_v10 = vmul.f32 %v2302_v28, %v2302_v28 }
 0x154   : > { %v2342_v44 = vpop.f32.mrf.mxu0  ;;  %v2344_v24 = vpop.f32.mrf.mxu1  ;;  %v1331_v46 = vadd.f32 %v1330_v31, %v1329_v50  ;;  %v1132_v47 = vadd.f32 %v1131_v34, %v1130_v0 }
 0x155   : > { %1053 = vst.msk [vmem:[%s1922_s24 + $0xb0] sm:$0xff] %vm1030_vm4, %v2342_v44  ;;  %1085 = vst.msk [vmem:[%s1922_s24 + $0x1b0] sm:$0xff] %vm1030_vm4, %v2344_v24  ;;  %v1336_v2 = vsel %vm1030_vm4, %v1253_v10, 0.0 }
 0x156   : > { %v865_v54 = vpop.f32.mrf.mxu0  ;;  %v993_v55 = vpop.f32.mrf.mxu1  ;;  %v1333_v20 = vadd.f32 %v1332_v42, %v1331_v46  ;;  %v1134_v8 = vadd.f32 %v1133_v43, %v1132_v47 }
 0x157   : > { %v1334_v54 = vsel %vm1030_vm4, %v1252_v35, 0.0  ;;  %v1135_v55 = vsel %vm1030_vm4, %v2302_v28, 0.0  ;;  %v1255_v28 = vmul.f32 %v2342_v44, %v2342_v44 }
 0x158   : > { %v866_v52 = vpop.f32.mrf.mxu0  ;;  %v2362_v32 = vpop.f32.mrf.mxu1  ;;  %v1335_v6 = vadd.f32 %v1334_v54, %v1333_v20  ;;  %v1136_v7 = vadd.f32 %v1135_v55, %v1134_v8 }
 0x159   : > { %1054 = vst.msk [vmem:[%s1922_s24 + $0xb8] sm:$0xff] %vm1030_vm4, %v866_v52  ;;  %1086 = vst.msk [vmem:[%s1922_s24 + $0x1b8] sm:$0xff] %vm1030_vm4, %v2362_v32  ;;  %v1256_v18 = vmul.f32 %v866_v52, %v866_v52  ;;  %v1340_v30 = vsel %vm1030_vm4, %v1255_v28, 0.0  ;;  %v1141_v31 = vsel %vm1030_vm4, %v866_v52, 0.0 }
 0x15a   : > { %v868_v14 = vpop.f32.mrf.mxu0  ;;  %v996_v15 = vpop.f32.mrf.mxu1  ;;  %v1337_v36 = vadd.f32 %v1336_v2, %v1335_v6  ;;  %v1138_v22 = vadd.f32 %v1137_v3, %v1136_v7 }
 0x15b   : > { %v1338_v14 = vsel %vm1030_vm4, %v1254_v58, 0.0  ;;  %v1139_v15 = vsel %vm1030_vm4, %v2342_v44, 0.0 }
 0x15c   : > { %v871_v60 = vpop.f32.mrf.mxu0  ;;  %v2379_v40 = vpop.f32.mrf.mxu1  ;;  %v1339_v35 = vadd.f32 %v1338_v14, %v1337_v36  ;;  %v1140_v50 = vadd.f32 %v1139_v15, %v1138_v22 }
 0x15d   : > { %1055 = vst.msk [vmem:[%s1922_s24 + $0xc0] sm:$0xff] %vm1030_vm4, %v871_v60  ;;  %1087 = vst.msk [vmem:[%s1922_s24 + $0x1c0] sm:$0xff] %vm1030_vm4, %v2379_v40  ;;  %v1257_v34 = vmul.f32 %v871_v60, %v871_v60 }
 0x15e   : > { %v873_v39 = vpop.f32.mrf.mxu0  ;;  %v1001_v16 = vpop.f32.mrf.mxu1  ;;  %v1341_v43 = vadd.f32 %v1340_v30, %v1339_v35  ;;  %v1142_v52 = vadd.f32 %v1141_v31, %v1140_v50 }
 0x15f   : > { %v1342_v39 = vsel %vm1030_vm4, %v1256_v18, 0.0  ;;  %v1143_v16 = vsel %vm1030_vm4, %v871_v60, 0.0  ;;  %v1344_v47 = vsel %vm1030_vm4, %v1257_v34, 0.0 }
 0x160   : > { %v874_v4 = vpop.f32.mrf.mxu0  ;;  %v2396_v48 = vpop.f32.mrf.mxu1  ;;  %v1343_v58 = vadd.f32 %v1342_v39, %v1341_v43  ;;  %v1144_v20 = vadd.f32 %v1143_v16, %v1142_v52 }
 0x161   : > { %1056 = vst.msk [vmem:[%s1922_s24 + $0xc8] sm:$0xff] %vm1030_vm4, %v874_v4  ;;  %1088 = vst.msk [vmem:[%s1922_s24 + $0x1c8] sm:$0xff] %vm1030_vm4, %v2396_v48  ;;  %v1258_v42 = vmul.f32 %v874_v4, %v874_v4  ;;  %v1145_v54 = vsel %vm1030_vm4, %v874_v4, 0.0 }
 0x162   : > { %v876_v62 = vpop.f32.mrf.mxu0  ;;  %v1004_v63 = vpop.f32.mrf.mxu1  ;;  %v1345_v3 = vadd.f32 %v1344_v47, %v1343_v58  ;;  %v1146_v4 = vadd.f32 %v1145_v54, %v1144_v20 }
 0x163   : > { %v1346_v62 = vsel %vm1030_vm4, %v1258_v42, 0.0 }
 0x164   : > { %v879_v12 = vpop.f32.mrf.mxu0  ;;  %v2413_v56 = vpop.f32.mrf.mxu1  ;;  %v1347_v18 = vadd.f32 %v1346_v62, %v1345_v3 }
 0x165   : > { %1057 = vst.msk [vmem:[%s1922_s24 + $0xd0] sm:$0xff] %vm1030_vm4, %v879_v12  ;;  %1089 = vst.msk [vmem:[%s1922_s24 + $0x1d0] sm:$0xff] %vm1030_vm4, %v2413_v56  ;;  %v1259_v55 = vmul.f32 %v879_v12, %v879_v12  ;;  %v1147_v63 = vsel %vm1030_vm4, %v879_v12, 0.0 }
 0x166   : > { %v881_v26 = vpop.f32.mrf.mxu0  ;;  %v1009_v23 = vpop.f32.mrf.mxu1  ;;  %v1148_v36 = vadd.f32 %v1147_v63, %v1146_v4  ;;  %v1265_v4 = vmul.f32 %v2053_v17, %v2053_v17 }
 0x167   : > { %v1348_v7 = vsel %vm1030_vm4, %v1259_v55, 0.0 }
 0x168   : > { %v882_v44 = vpop.f32.mrf.mxu0  ;;  %v2425_v0 = vpop.f32.mrf.mxu1  ;;  %v1349_v31 = vadd.f32 %v1348_v7, %v1347_v18 }
 0x169   : > { %1058 = vst.msk [vmem:[%s1922_s24 + $0xd8] sm:$0xff] %vm1030_vm4, %v882_v44  ;;  %1090 = vst.msk [vmem:[%s1922_s24 + $0x1d8] sm:$0xff] %vm1030_vm4, %v2425_v0  ;;  %v1260_v2 = vmul.f32 %v882_v44, %v882_v44  ;;  %v1149_v14 = vsel %vm1030_vm4, %v882_v44, 0.0 }
 0x16a   : > { %v884_v10 = vpop.f32.mrf.mxu0  ;;  %v1012_v46 = vpop.f32.mrf.mxu1  ;;  %v1150_v34 = vadd.f32 %v1149_v14, %v1148_v36  ;;  %v1159_v36 = vsel %vm1030_vm4, %v2053_v17, 0.0  ;;  %v1163_v17 = vsel %vm1030_vm4, %v2073_v25, 0.0 }
 0x16b   : > { %v1350_v26 = vsel %vm1030_vm4, %v1260_v2, 0.0 }
 0x16c   : > { %v887_v60 = vpop.f32.mrf.mxu0  ;;  %v2436_v8 = vpop.f32.mrf.mxu1  ;;  %v1351_v16 = vadd.f32 %v1350_v26, %v1349_v31  ;;  %v1360_v31 = vsel %vm1030_vm4, %v1265_v4, 0.0 }
 0x16d   : > { %1059 = vst.msk [vmem:[%s1922_s24 + $0xe0] sm:$0xff] %vm1030_vm4, %v887_v60  ;;  %1091 = vst.msk [vmem:[%s1922_s24 + $0x1e0] sm:$0xff] %vm1030_vm4, %v2436_v8  ;;  %v1261_v15 = vmul.f32 %v887_v60, %v887_v60  ;;  %v1151_v23 = vsel %vm1030_vm4, %v887_v60, 0.0 }
 0x16e   : > { %v889_v28 = vpop.f32.mrf.mxu0  ;;  %v1017_v6 = vpop.f32.mrf.mxu1  ;;  %v1152_v42 = vadd.f32 %v1151_v23, %v1150_v34  ;;  %v1161_v34 = vsel %vm1030_vm4, %v2063_v21, 0.0 }
 0x16f   : > { %v1352_v44 = vsel %vm1030_vm4, %v1261_v15, 0.0 }
 0x170   : > { %v890_v12 = vpop.f32.mrf.mxu0  ;;  %v2447_v22 = vpop.f32.mrf.mxu1  ;;  %v1353_v54 = vadd.f32 %v1352_v44, %v1351_v16  ;;  %v1268_v16 = vmul.f32 %v2083_v29, %v2083_v29 }
 0x171   : > { %1060 = vst.msk [vmem:[%s1922_s24 + $0xe8] sm:$0xff] %vm1030_vm4, %v890_v12  ;;  %v1262_v30 = vmul.f32 %v890_v12, %v890_v12  ;;  %1092 = vst.msk [vmem:[%s1922_s24 + $0x1e8] sm:$0xff] %vm1030_vm4, %v2447_v22  ;;  %v1153_v39 = vsel %vm1030_vm4, %v890_v12, 0.0  ;;  %v1266_v12 = vmul.f32 %v2063_v21, %v2063_v21  ;;  %v1165_v21 = vsel %vm1030_vm4, %v2083_v29, 0.0 }
 0x172   : > { %v892_v35 = vpop.f32.mrf.mxu0  ;;  %v1020_v50 = vpop.f32.mrf.mxu1  ;;  %v1154_v55 = vadd.f32 %v1153_v39, %v1152_v42  ;;  %v1169_v29 = vsel %vm1030_vm4, %v2103_v37, 0.0 }
 0x173   : > { %v1354_v10 = vsel %vm1030_vm4, %v1262_v30, 0.0  ;;  %v1267_v35 = vmul.f32 %v2073_v25, %v2073_v25  ;;  %v1362_v39 = vsel %vm1030_vm4, %v1266_v12, 0.0  ;;  %v1167_v25 = vsel %vm1030_vm4, %v2093_v33, 0.0 }
 0x174   : > { %v895_v43 = vpop.f32.mrf.mxu0  ;;  %v2458_v52 = vpop.f32.mrf.mxu1  ;;  %v1355_v62 = vadd.f32 %v1354_v10, %v1353_v54 }
 0x175   : > { %1061 = vst.msk [vmem:[%s1922_s24 + $0xf0] sm:$0xff] %vm1030_vm4, %v895_v43  ;;  %v1155_v46 = vsel %vm1030_vm4, %v895_v43, 0.0  ;;  %v1263_v47 = vmul.f32 %v895_v43, %v895_v43  ;;  %1093 = vst.msk [vmem:[%s1922_s24 + $0x1f0] sm:$0xff] %vm1030_vm4, %v2458_v52  ;;  %v1364_v10 = vsel %vm1030_vm4, %v1267_v35, 0.0  ;;  %v1275_v35 = vmul.f32 %v2153_v57, %v2153_v57 }
 0x176   : > { %v897_v58 = vpop.f32.mrf.mxu0  ;;  %v1025_v20 = vpop.f32.mrf.mxu1  ;;  %v1156_v63 = vadd.f32 %v1155_v46, %v1154_v55  ;;  %v1269_v46 = vmul.f32 %v2093_v33, %v2093_v33  ;;  %v1366_v55 = vsel %vm1030_vm4, %v1268_v16, 0.0  ;;  %v1171_v33 = vsel %vm1030_vm4, %v2113_v41, 0.0 }
 0x177   : > { %v1356_v60 = vsel %vm1030_vm4, %v1263_v47, 0.0  ;;  %v1270_v58 = vmul.f32 %v2103_v37, %v2103_v37  ;;  %v1173_v37 = vsel %vm1030_vm4, %v2123_v45, 0.0 }
 0x178   : > { %v898_v2 = vpop.f32.mrf.mxu0  ;;  %v2468_v3 = vpop.f32.mrf.mxu1  ;;  %v1357_v7 = vadd.f32 %v1356_v60, %v1355_v62  ;;  %v1368_v62 = vsel %vm1030_vm4, %v1269_v46, 0.0 }
 0x179   : > { %1062 = vst.msk [vmem:[%s1922_s24 + $0xf8] sm:$0xff] %vm1030_vm4, %v898_v2  ;;  %v1157_v28 = vsel %vm1030_vm4, %v898_v2, 0.0  ;;  %v1264_v6 = vmul.f32 %v898_v2, %v898_v2  ;;  %1094 = vst.msk [vmem:[%s1922_s24 + $0x1f8] sm:$0xff] %vm1030_vm4, %v2468_v3  ;;  %s1459_s24 = sshll.u32 %s1877_s23, 4  ;;  %s1460_s24 = int_to_ptr.vmem [resolvable:$true] %s1459_s24 }
 0x17a   : > { %v1158_v14 = vadd.f32 %v1157_v28, %v1156_v63  ;;  %v900_v15 = vpop.f32.mrf.mxu0  ;;  %v1028_v18 = vpop.f32.mrf.mxu1  ;;  %v1271_v63 = vmul.f32 %v2113_v41, %v2113_v41  ;;  %v1370_v28 = vsel %vm1030_vm4, %v1270_v58, 0.0  ;;  %v1175_v41 = vsel %vm1030_vm4, %v2133_v49, 0.0 }
 0x17b   : > { %v1358_v26 = vsel %vm1030_vm4, %v1264_v6, 0.0  ;;  %v1272_v6 = vmul.f32 %v2123_v45, %v2123_v45  ;;  %v1273_v18 = vmul.f32 %v2133_v49, %v2133_v49  ;;  %v1177_v45 = vsel %vm1030_vm4, %v2143_v53, 0.0 }
 0x17c   : > { %v1160_v23 = vadd.f32 %v1159_v36, %v1158_v14  ;;  %v1359_v30 = vadd.f32 %v1358_v26, %v1357_v7  ;;  %v1372_v15 = vsel %vm1030_vm4, %v1271_v63, 0.0  ;;  %v1179_v49 = vsel %vm1030_vm4, %v2153_v57, 0.0 }
 0x17d   : > { %v1374_v26 = vsel %vm1030_vm4, %v1272_v6, 0.0  ;;  %v1183_v57 = vsel %vm1030_vm4, %v2173_v1, 0.0  ;;  %v1280_v63 = vmul.f32 %v2203_v13, %v2203_v13 }
 0x17e   : > { %v1162_v50 = vadd.f32 %v1161_v34, %v1160_v23  ;;  %v1361_v44 = vadd.f32 %v1360_v31, %v1359_v30  ;;  %v1274_v23 = vmul.f32 %v2143_v53, %v2143_v53  ;;  %v1376_v34 = vsel %vm1030_vm4, %v1273_v18, 0.0 }
 0x17f   : > { %v1181_v53 = vsel %vm1030_vm4, %v2163_v61, 0.0 }
 0x180   : > { %v1164_v42 = vadd.f32 %v1163_v17, %v1162_v50  ;;  %v1363_v43 = vadd.f32 %v1362_v39, %v1361_v44  ;;  %v1378_v39 = vsel %vm1030_vm4, %v1274_v23, 0.0  ;;  %v1276_v17 = vmul.f32 %v2163_v61, %v2163_v61 }
 0x181   : > { %v1185_v61 = vsel %vm1030_vm4, %v2183_v5, 0.0 }
 0x182   : > { %v1166_v47 = vadd.f32 %v1165_v21, %v1164_v42  ;;  %v1365_v54 = vadd.f32 %v1364_v10, %v1363_v43  ;;  %v1380_v43 = vsel %vm1030_vm4, %v1275_v35, 0.0  ;;  %v1277_v10 = vmul.f32 %v2173_v1, %v2173_v1 }
 0x183   : > { %v1187_v1 = vsel %vm1030_vm4, %v2193_v9, 0.0  ;;  %v1285_v35 = vmul.f32 %v2304_v59, %v2304_v59 }
 0x184   : > { %v1168_v20 = vadd.f32 %v1167_v25, %v1166_v47  ;;  %v1367_v60 = vadd.f32 %v1366_v55, %v1365_v54  ;;  %v1382_v47 = vsel %vm1030_vm4, %v1276_v17, 0.0  ;;  %v1278_v54 = vmul.f32 %v2183_v5, %v2183_v5 }
 0x185   : > { %v1384_v58 = vsel %vm1030_vm4, %v1277_v10, 0.0  ;;  %v1189_v5 = vsel %vm1030_vm4, %v2203_v13, 0.0  ;;  %v1193_v13 = vsel %vm1030_vm4, %v2244_v51, 0.0 }
 0x186   : > { %v1170_v2 = vadd.f32 %v1169_v29, %v1168_v20  ;;  %v1369_v4 = vadd.f32 %v1368_v62, %v1367_v60  ;;  %v1279_v20 = vmul.f32 %v2193_v9, %v2193_v9  ;;  %v1386_v29 = vsel %vm1030_vm4, %v1278_v54, 0.0 }
 0x187   : > { %v1191_v9 = vsel %vm1030_vm4, %v2221_v27, 0.0 }
 0x188   : > { %v1172_v7 = vadd.f32 %v1171_v33, %v1170_v2  ;;  %v1371_v14 = vadd.f32 %v1370_v28, %v1369_v4  ;;  %v1388_v28 = vsel %vm1030_vm4, %v1279_v20, 0.0  ;;  %v1281_v33 = vmul.f32 %v2221_v27, %v2221_v27 }
 0x189   : > { %v1195_v27 = vsel %vm1030_vm4, %v2264_v11, 0.0  ;;  %v1290_v20 = vmul.f32 %v2396_v48, %v2396_v48 }
 0x18a   : > { %v1174_v36 = vadd.f32 %v1173_v37, %v1172_v7  ;;  %v1373_v12 = vadd.f32 %v1372_v15, %v1371_v14  ;;  %v1390_v14 = vsel %vm1030_vm4, %v1280_v63, 0.0  ;;  %v1282_v15 = vmul.f32 %v2244_v51, %v2244_v51 }
 0x18b   : > { %v1197_v51 = vsel %vm1030_vm4, %v2284_v38, 0.0 }
 0x18c   : > { %v1375_v30 = vadd.f32 %v1374_v26, %v1373_v12  ;;  %v1176_v31 = vadd.f32 %v1175_v41, %v1174_v36  ;;  %v1392_v36 = vsel %vm1030_vm4, %v1281_v33, 0.0  ;;  %v1283_v12 = vmul.f32 %v2264_v11, %v2264_v11 }
 0x18d   : > { %v1394_v23 = vsel %vm1030_vm4, %v1282_v15, 0.0  ;;  %v1199_v11 = vsel %vm1030_vm4, %v2304_v59, 0.0  ;;  %v1203_v59 = vsel %vm1030_vm4, %v2344_v24, 0.0 }
 0x18e   : > { %v1178_v50 = vadd.f32 %v1177_v45, %v1176_v31  ;;  %v1377_v44 = vadd.f32 %v1376_v34, %v1375_v30  ;;  %v1284_v30 = vmul.f32 %v2284_v38, %v2284_v38  ;;  %v1396_v45 = vsel %vm1030_vm4, %v1283_v12, 0.0 }
 0x18f   : > { %v1201_v38 = vsel %vm1030_vm4, %v2324_v19, 0.0  ;;  %v1295_v12 = vmul.f32 %v2458_v52, %v2458_v52 }
 0x190   : > { %v1180_v16 = vadd.f32 %v1179_v49, %v1178_v50  ;;  %v1379_v42 = vadd.f32 %v1378_v39, %v1377_v44  ;;  %v1398_v39 = vsel %vm1030_vm4, %v1284_v30, 0.0  ;;  %v1286_v49 = vmul.f32 %v2324_v19, %v2324_v19 }
 0x191   : > { %v1205_v19 = vsel %vm1030_vm4, %v2362_v32, 0.0 }
 0x192   : > { %v1182_v21 = vadd.f32 %v1181_v53, %v1180_v16  ;;  %v1381_v46 = vadd.f32 %v1380_v43, %v1379_v42  ;;  %v1400_v42 = vsel %vm1030_vm4, %v1285_v35, 0.0  ;;  %v1287_v43 = vmul.f32 %v2344_v24, %v2344_v24 }
 0x193   : > { %v1207_v24 = vsel %vm1030_vm4, %v2379_v40, 0.0 }
 0x194   : > { %v1184_v55 = vadd.f32 %v1183_v57, %v1182_v21  ;;  %v1383_v25 = vadd.f32 %v1382_v47, %v1381_v46  ;;  %v1402_v21 = vsel %vm1030_vm4, %v1286_v49, 0.0  ;;  %v1288_v46 = vmul.f32 %v2362_v32, %v2362_v32 }
 0x195   : > { %v1404_v54 = vsel %vm1030_vm4, %v1287_v43, 0.0  ;;  %v1209_v32 = vsel %vm1030_vm4, %v2396_v48, 0.0  ;;  %v1213_v48 = vsel %vm1030_vm4, %v2425_v0, 0.0  ;;  %v1095_v43 = vld [vmem:[#allocation2] sm:$0x1] }
 0x196   : > { %v1186_v60 = vadd.f32 %v1185_v61, %v1184_v55  ;;  %v1385_v62 = vadd.f32 %v1384_v58, %v1383_v25  ;;  %v1289_v55 = vmul.f32 %v2379_v40, %v2379_v40  ;;  %v1406_v61 = vsel %vm1030_vm4, %v1288_v46, 0.0 }
 0x197   : > { %v1211_v40 = vsel %vm1030_vm4, %v2413_v56, 0.0 }
 0x198   : > { %v1188_v2 = vadd.f32 %v1187_v1, %v1186_v60  ;;  %v1387_v4 = vadd.f32 %v1386_v29, %v1385_v62  ;;  %v1408_v29 = vsel %vm1030_vm4, %v1289_v55, 0.0  ;;  %v1291_v1 = vmul.f32 %v2413_v56, %v2413_v56 }
 0x199   : > { %v1215_v56 = vsel %vm1030_vm4, %v2436_v8, 0.0 }
 0x19a   : > { %v1190_v6 = vadd.f32 %v1189_v5, %v1188_v2  ;;  %v1389_v7 = vadd.f32 %v1388_v28, %v1387_v4  ;;  %v1410_v4 = vsel %vm1030_vm4, %v1290_v20, 0.0  ;;  %v1292_v28 = vmul.f32 %v2425_v0, %v2425_v0 }
 0x19b   : > { %v1217_v0 = vsel %vm1030_vm4, %v2447_v22, 0.0 }
 0x19c   : > { %v1192_v37 = vadd.f32 %v1191_v9, %v1190_v6  ;;  %v1391_v18 = vadd.f32 %v1390_v14, %v1389_v7  ;;  %v1412_v6 = vsel %vm1030_vm4, %v1291_v1, 0.0  ;;  %v1293_v7 = vmul.f32 %v2436_v8, %v2436_v8 }
 0x19d   : > { %v1414_v15 = vsel %vm1030_vm4, %v1292_v28, 0.0  ;;  %v1219_v8 = vsel %vm1030_vm4, %v2458_v52, 0.0 }
 0x19e   : > { %v1194_v26 = vadd.f32 %v1193_v13, %v1192_v37  ;;  %v1393_v41 = vadd.f32 %v1392_v36, %v1391_v18  ;;  %v1294_v37 = vmul.f32 %v2447_v22, %v2447_v22  ;;  %v1416_v13 = vsel %vm1030_vm4, %v1293_v7, 0.0 }
 0x19f   : > { %v1221_v22 = vsel %vm1030_vm4, %v2468_v3, 0.0 }
 0x1a0   : > { %v1395_v31 = vadd.f32 %v1394_v23, %v1393_v41  ;;  %v1196_v34 = vadd.f32 %v1195_v27, %v1194_v26  ;;  %v1418_v23 = vsel %vm1030_vm4, %v1294_v37, 0.0  ;;  %v1296_v27 = vmul.f32 %v2468_v3, %v2468_v3 }
 0x1a2   : > { %v1397_v50 = vadd.f32 %v1396_v45, %v1395_v31  ;;  %v1198_v44 = vadd.f32 %v1197_v51, %v1196_v34  ;;  %v1420_v34 = vsel %vm1030_vm4, %v1295_v12, 0.0  ;;  %v1422_v35 = vsel %vm1030_vm4, %v1296_v27, 0.0 }
 0x1a4   : > { %v1399_v17 = vadd.f32 %v1398_v39, %v1397_v50  ;;  %v1200_v16 = vadd.f32 %v1199_v11, %v1198_v44 }
 0x1a6   : > { %v1401_v53 = vadd.f32 %v1400_v42, %v1399_v17  ;;  %v1202_v10 = vadd.f32 %v1201_v38, %v1200_v16 }
 0x1a8   : > { %v1403_v47 = vadd.f32 %v1402_v21, %v1401_v53  ;;  %v1204_v57 = vadd.f32 %v1203_v59, %v1202_v10  ;;  %v1232_v10 = vld [vmem:[#allocation4] sm:$0x1] }
 0x1aa   : > { %v1405_v25 = vadd.f32 %v1404_v54, %v1403_v47  ;;  %v1206_v58 = vadd.f32 %v1205_v19, %v1204_v57 }
 0x1ac   : > { %v1407_v60 = vadd.f32 %v1406_v61, %v1405_v25  ;;  %v1208_v62 = vadd.f32 %v1207_v24, %v1206_v58 }
 0x1ae   : > { %v1409_v63 = vadd.f32 %v1408_v29, %v1407_v60  ;;  %v1210_v2 = vadd.f32 %v1209_v32, %v1208_v62 }
 0x1b0   : > { %v1411_v5 = vadd.f32 %v1410_v4, %v1409_v63  ;;  %v1212_v33 = vadd.f32 %v1211_v40, %v1210_v2 }
 0x1b2   : > { %v1413_v14 = vadd.f32 %v1412_v6, %v1411_v5  ;;  %v1214_v9 = vadd.f32 %v1213_v48, %v1212_v33 }
 0x1b4   : > { %v1415_v18 = vadd.f32 %v1414_v15, %v1413_v14  ;;  %v1216_v36 = vadd.f32 %v1215_v56, %v1214_v9 }
 0x1b6   : > { %v1417_v26 = vadd.f32 %v1416_v13, %v1415_v18  ;;  %v1218_v41 = vadd.f32 %v1217_v0, %v1216_v36 }
 0x1b8   : > { %v1419_v30 = vadd.f32 %v1418_v23, %v1417_v26  ;;  %v1220_v31 = vadd.f32 %v1219_v8, %v1218_v41 }
 0x1ba   : > { %v1421_v45 = vadd.f32 %v1420_v34, %v1419_v30  ;;  %v1222_v51 = vadd.f32 %v1221_v22, %v1220_v31 }
 0x1bc   : > { %v1223_v50 = vrot.slane %v1222_v51, 4  ;;  %v1423_v44 = vadd.f32 %v1422_v35, %v1421_v45 }
 0x1be   : > { %v1224_v39 = vadd.f32 %v1223_v50, %v1222_v51  ;;  %v1424_v11 = vrot.slane %v1423_v44, 4 }
 0x1c0   : > { %v1225_v52 = vrot.slane %v1224_v39, 2  ;;  %v1425_v49 = vadd.f32 %v1424_v11, %v1423_v44 }
 0x1c2   : > { %v1226_v17 = vadd.f32 %v1225_v52, %v1224_v39  ;;  %v1426_v16 = vrot.slane %v1425_v49, 2 }
 0x1c4   : > { %v1227_v42 = vrot.slane %v1226_v17, 1  ;;  %v1427_v38 = vadd.f32 %v1426_v16, %v1425_v49 }
 0x1c6   : > { %v1228_v3 = vadd.f32 %v1227_v42, %v1226_v17  ;;  %v1428_v53 = vrot.slane %v1427_v38, 1 }
 0x1c8   : > { %v1229_v21 = vadd.f32 %v1228_v3, %v1095_v43  ;;  %v1429_v59 = vadd.f32 %v1428_v53, %v1427_v38 }
 0x1ca   : > { %1231 = vst.msk [vmem:[#allocation2] sm:$0x1] %vm1230_vm5, %v1229_v21  ;;  %v1430_v46 = vadd.f32 %v1429_v59, %v1232_v10 }
 0x1cb   : > { %1822 = shalt.err (!%p1819_p12)
}
 0x1cc   : > { %1679 = dma.vmem_to_hbm [thread:$0]  (%p1686_p5), %s1449_s22, 16, %s2668_s3, [#allocation3]   ;;  %1431 = vst.msk [vmem:[#allocation4] sm:$0x1] %vm1230_vm5, %v1430_v46 }
 0x1cd   : > { %s1833_s29 = scalar_lea.vmem %s1460_s24, 16  ;;  %s1839_s30 = scalar_lea.vmem %s1460_s24, 32 }
 0x1ce   : > { %p1834_p13 = scmp.ne.s32.totalorder %s1460_s24, %s1833_s29  ;;  %p1840_p2 = scmp.lt.s32.totalorder %s1460_s24, %s1460_s24 }
 0x1cf   : > { %p1841_p3 = scmp.lt.s32.totalorder %s1839_s30, %s1833_s29 }
 0x1d0   : > { %p1835_p0 = pnand %p1834_p13, %p1686_p5 }
 0x1d1   : > { %p1842_p4 = por %p1841_p3, %p1840_p2 }
 0x1d2   : > { %p1836_p1 = pneg %p1835_p0 }
 0x1d4   : > { %p1843_p6 = pnand %p1842_p4, %p1836_p1 }
 0x1d6   : > { %1846 = shalt.err (!%p1843_p6)
}
 0x1d7   : > { %1681 = dma.vmem_to_hbm [thread:$0]  (%p1686_p5), %s1460_s24, 16, %s2669_s4, [#allocation5]  }
 0x1d8   : > { %1862 = dma.done.wait (%p1686_p5), [#allocation3], 16  }
 0x1d9   : > { %1864 = vsyncadd (%p1686_p5), [#allocation3], 4294967280 }
 0x1da   : > { %1866 = dma.done.wait (%p1686_p5), [#allocation5], 16  }
 0x1db   : > { %1868 = vsyncadd (%p1686_p5), [#allocation5], 4294967280 }
 0x1dc PF: > { %s17_s15 = sadd.s32 1, %s1871_s15  }
 0x1dd   : > { %p14_p7 = scmp.ge.s32.totalorder %s17_s15, 6  }
 0x1df   :  { %16 = sbr.rel (!%p14_p7) target bundleno = 2 (0x2), region = 79 }
 0x1e4   :  { %1484 = vsyncpa [#allocation3], 1 }
 0x1e5   :  { %1486 = vsyncpa [#allocation3 + $0x1], 1 }
 0x1e6   :  { %1487 = vsyncpa [#allocation5], 1 }

</bundles_post_ra>
